<compile_context>
chip_gen: v7x
topology: tpu7x:2x2x1
jax: 0.10.0
libtpu: 0.0.40
codegen_flags: <defaults>
</compile_context>

<pallas_src>
import functools

import jax
import jax.numpy as jnp
from jax import lax
from jax.experimental import pallas as pl
from jax.experimental.pallas import tpu as pltpu


_PARALLEL_1D = pltpu.CompilerParams(dimension_semantics=("parallel",))


def _choose_tile(m, max_tile):
    """Pick an M tile (and padded M) — tile == M when small, else max_tile."""
    if m <= max_tile:
        return m, m
    return max_tile, pl.cdiv(m, max_tile) * max_tile


# ----------------------------- Pallas kernels ------------------------------ #

def _matmul_bias_kernel(x_ref, w_ref, b_ref, o_ref, *, relu):
    acc = jnp.dot(x_ref[...], w_ref[...], preferred_element_type=jnp.float32)
    acc = acc + b_ref[...]
    if relu:
        acc = jnp.maximum(acc, 0.0)
    o_ref[...] = acc.astype(o_ref.dtype)


def matmul_bias(x, w, b, relu=False, out_dtype=jnp.float32, max_tile=512):
    """x:(M,K) bf16 @ w:(K,N) bf16 + b:(1,N) f32, gridded over M, f32 accumulate."""
    M, K = x.shape
    K2, N = w.shape
    assert K == K2
    b2 = b.reshape(1, -1).astype(jnp.float32)
    tm, Mp = _choose_tile(M, max_tile)
    xp = x if Mp == M else jnp.pad(x, ((0, Mp - M), (0, 0)))
    out = pl.pallas_call(
        functools.partial(_matmul_bias_kernel, relu=relu),
        out_shape=jax.ShapeDtypeStruct((Mp, N), out_dtype),
        grid=(Mp // tm,),
        in_specs=[pl.BlockSpec((tm, K), lambda i: (i, 0)),
                  pl.BlockSpec((K, N), lambda i: (0, 0)),   # resident weights
                  pl.BlockSpec((1, N), lambda i: (0, 0))],  # resident bias
        out_specs=pl.BlockSpec((tm, N), lambda i: (i, 0)),
        compiler_params=_PARALLEL_1D,
    )(xp, w, b2)
    return out if Mp == M else out[:M]


def _maxpool_relu_kernel(x_ref, o_ref, *, c):
    # x_ref block: (tm, 2, Wo, 2*C)  -- row-pair in a leading dim, W-phase pair
    # folded into the lane dim so the source is read exactly once.
    top = x_ref[:, 0, :, :]                   # (tm, Wo, 2C)
    bot = x_ref[:, 1, :, :]
    m = jnp.maximum(top, bot)                 # pool across H
    m = jnp.maximum(m[:, :, :c], m[:, :, c:])  # pool across W (lane halves)
    o_ref[...] = jnp.maximum(m, 0).astype(o_ref.dtype)


def maxpool2x2_relu(x, max_tile=256):
    """relu(maxpool2x2(x)) for x:(N,H,W,C) NHWC with even H,W (single HBM read)."""
    N, H, W, C = x.shape
    Ho, Wo = H // 2, W // 2
    xr = x.reshape(N * Ho, 2, Wo, 2 * C)      # free reshape (contiguous)
    M = N * Ho
    tm, Mp = _choose_tile(M, max_tile)
    if Mp != M:
        xr = jnp.pad(xr, ((0, Mp - M), (0, 0), (0, 0), (0, 0)))
    out = pl.pallas_call(
        functools.partial(_maxpool_relu_kernel, c=C),
        out_shape=jax.ShapeDtypeStruct((Mp, Wo, C), x.dtype),
        grid=(Mp // tm,),
        in_specs=[pl.BlockSpec((tm, 2, Wo, 2 * C), lambda i: (i, 0, 0, 0))],
        out_specs=pl.BlockSpec((tm, Wo, C), lambda i: (i, 0, 0)),
        compiler_params=_PARALLEL_1D,
    )(xr)
    if Mp != M:
        out = out[:M]
    return out.reshape(N, Ho, Wo, C)


def _head_kernel(x_ref, w3_ref, b3_ref, w4_ref, b4_ref, w5_ref, b5_ref, o_ref,
                 *, n_classes):
    # conv3 (as dense 512->256) + relu
    h = jnp.dot(x_ref[...], w3_ref[...], preferred_element_type=jnp.float32)
    h = jnp.maximum(h + b3_ref[...], 0.0)
    # fc1 (256 -> 84, zero-padded to 128 lanes) + relu
    h = jnp.dot(h.astype(jnp.bfloat16), w4_ref[...],
                preferred_element_type=jnp.float32)
    h = jnp.maximum(h + b4_ref[...], 0.0)
    # fc2 (84 -> 10, zero-padded K/N to 128)
    z = jnp.dot(h.astype(jnp.bfloat16), w5_ref[...],
                preferred_element_type=jnp.float32)
    z = z + b5_ref[...]
    # mask padded classes, then stable logsoftmax over the lane dim
    col = lax.broadcasted_iota(jnp.int32, z.shape, 1)
    z = jnp.where(col < n_classes, z, -1e30)
    m = jnp.max(z, axis=-1, keepdims=True)
    s = z - m
    lse = jnp.log(jnp.sum(jnp.exp(s), axis=-1, keepdims=True))
    o_ref[...] = (s - lse).astype(o_ref.dtype)


def head_fused(x, w3, b3, w4, b4, w5, b5, n_classes=10, max_tile=512):
    """Fused conv3(as matmul)+relu -> fc1+relu -> fc2 -> logsoftmax."""
    M, K = x.shape
    NP = w5.shape[1]                      # padded class dim (128)
    tm, Mp = _choose_tile(M, max_tile)
    xp = x if Mp == M else jnp.pad(x, ((0, Mp - M), (0, 0)))
    const = lambda i: (0, 0)
    out = pl.pallas_call(
        functools.partial(_head_kernel, n_classes=n_classes),
        out_shape=jax.ShapeDtypeStruct((Mp, NP), jnp.float32),
        grid=(Mp // tm,),
        in_specs=[pl.BlockSpec((tm, K), lambda i: (i, 0)),
                  pl.BlockSpec(w3.shape, const), pl.BlockSpec(b3.shape, const),
                  pl.BlockSpec(w4.shape, const), pl.BlockSpec(b4.shape, const),
                  pl.BlockSpec(w5.shape, const), pl.BlockSpec(b5.shape, const)],
        out_specs=pl.BlockSpec((tm, NP), lambda i: (i, 0)),
        compiler_params=_PARALLEL_1D,
    )(xp, w3, b3, w4, b4, w5, b5)
    if Mp != M:
        out = out[:M]
    return out[:, :n_classes]


# ------------------------------- Glue (JAX) -------------------------------- #

def im2col(x, k, stride, pad):
    """x:(N,H,W,C) NHWC -> patch matrix (N*Ho*Wo, k*k*C), row order (kh,kw,Cin)."""
    x = jnp.pad(x, ((0, 0), (pad, pad), (pad, pad), (0, 0)))
    N, H, W, C = x.shape
    Ho = (H - k) // stride + 1
    Wo = (W - k) // stride + 1
    cols = []
    for di in range(k):
        for dj in range(k):
            cols.append(x[:, di:di + stride * Ho:stride,
                          dj:dj + stride * Wo:stride, :])
    p = jnp.stack(cols, axis=3)                   # (N,Ho,Wo,k*k,C)
    return p.reshape(N * Ho * Wo, k * k * C), (N, Ho, Wo)


def init_params(key):
    """Deterministic PyTorch-style uniform(-1/sqrt(fan_in), 1/sqrt(fan_in))."""
    def uniform(k, shape, fan_in):
        bound = 1.0 / (fan_in ** 0.5)
        return jax.random.uniform(k, shape, jnp.float32, -bound, bound)

    keys = jax.random.split(key, 10)
    return {
        "conv1_w": uniform(keys[0], (64, 1, 5, 5), 1 * 25),
        "conv1_b": uniform(keys[1], (64,), 1 * 25),
        "conv2_w": uniform(keys[2], (128, 64, 5, 5), 64 * 25),
        "conv2_b": uniform(keys[3], (128,), 64 * 25),
        "conv3_w": uniform(keys[4], (256, 128, 5, 5), 128 * 25),
        "conv3_b": uniform(keys[5], (256,), 128 * 25),
        "fc1_w": uniform(keys[6], (84, 256), 256),
        "fc1_b": uniform(keys[7], (84,), 256),
        "fc2_w": uniform(keys[8], (10, 84), 84),
        "fc2_b": uniform(keys[9], (10,), 84),
    }


def prepare_params(p):
    """One-time layout transforms: OIHW -> matmul matrices, lane padding, bf16."""
    bf16, f32 = jnp.bfloat16, jnp.float32

    def conv_w(w_oihw):                       # (Cout,Cin,kH,kW) -> (kH*kW*Cin, Cout)
        Cout, Cin, kH, kW = w_oihw.shape
        return jnp.transpose(w_oihw, (2, 3, 1, 0)).reshape(kH * kW * Cin, Cout)

    w1 = jnp.pad(conv_w(p["conv1_w"]), ((0, 7), (0, 0)))     # K 25 -> 32
    w2 = conv_w(p["conv2_w"])                                  # (1600, 128)
    # conv3 on a 2x2 spatial input (28x28 net) only touches taps (2:4, 2:4).
    w3 = jnp.transpose(p["conv3_w"][:, :, 2:4, 2:4],
                       (2, 3, 1, 0)).reshape(2 * 2 * 128, 256)  # (512, 256)
    w4 = jnp.pad(p["fc1_w"].T, ((0, 0), (0, 44)))              # (256, 128)
    b4 = jnp.pad(p["fc1_b"], (0, 44))
    w5 = jnp.pad(p["fc2_w"].T, ((0, 44), (0, 118)))            # (128, 128)
    b5 = jnp.pad(p["fc2_b"], (0, 118))
    return {
        "w1": w1.astype(bf16), "b1": p["conv1_b"].reshape(1, -1).astype(f32),
        "w2": w2.astype(bf16), "b2": p["conv2_b"].reshape(1, -1).astype(f32),
        "w3": w3.astype(bf16), "b3": p["conv3_b"].reshape(1, -1).astype(f32),
        "w4": w4.astype(bf16), "b4": b4.reshape(1, -1).astype(f32),
        "w5": w5.astype(bf16), "b5": b5.reshape(1, -1).astype(f32),
    }


def net_forward(mp, x_nchw):
    """Mirrors Net.forward. x_nchw: (N,1,28,28) f32 (PyTorch NCHW)."""
    n = x_nchw.shape[0]
    x = jnp.transpose(x_nchw, (0, 2, 3, 1)).astype(jnp.bfloat16)        # NHWC bf16
    # conv1 (5x5, s2, p2) -> (N,14,14,64)
    p1, (_, h1, w1o) = im2col(x, 5, 2, 2)
    p1 = jnp.pad(p1, ((0, 0), (0, mp["w1"].shape[0] - p1.shape[1])))    # K 25 -> 32
    c1 = matmul_bias(p1, mp["w1"], mp["b1"], out_dtype=jnp.bfloat16)
    a1 = maxpool2x2_relu(c1.reshape(n, h1, w1o, 64))                     # (N,7,7,64)
    # conv2 (5x5, s2, p2) -> (N,4,4,128)
    p2, (_, h2, w2o) = im2col(a1, 5, 2, 2)
    c2 = matmul_bias(p2, mp["w2"], mp["b2"], out_dtype=jnp.bfloat16)
    a2 = maxpool2x2_relu(c2.reshape(n, h2, w2o, 128))                    # (N,2,2,128)
    assert a2.shape[1:3] == (2, 2), "fused head assumes 28x28 inputs (MNIST-like)"
    flat = a2.reshape(n, 2 * 2 * 128)                                    # (N, 512)
    # fused: conv3 + relu + fc1 + relu + fc2 + logsoftmax
    return head_fused(flat, mp["w3"], mp["b3"], mp["w4"], mp["b4"],
                      mp["w5"], mp["b5"])


if __name__ == "__main__":
    key = jax.random.PRNGKey(0)
    pkey, xkey = jax.random.split(key)
    params = init_params(pkey)
    mparams = prepare_params(params)      # one-time, outside jit / the hot path
    # The FC head requires 28x28 inputs (MNIST-like): conv/pool chain -> (N,256).
    x = jax.random.normal(xkey, (2, 1, 28, 28), jnp.float32)
    out = jax.jit(net_forward)(mparams, x)
    out = jax.block_until_ready(out)
    assert out.shape == (2, 10)
    assert bool(jnp.all(jnp.isfinite(out)))
    print("KERNEL_OK")
</pallas_src>

<mosaic_0001>
module attributes {stable_mosaic.version = 11 : i64} {
  func.func @_matmul_bias_kernel(%arg0: i32, %arg1: memref<392x32xbf16, #tpu.memory_space<vmem>>, %arg2: memref<32x64xbf16, #tpu.memory_space<vmem>>, %arg3: memref<1x64xf32, #tpu.memory_space<vmem>>, %arg4: memref<392x64xbf16, #tpu.memory_space<vmem>>) attributes {dimension_semantics = [#tpu.dimension_semantics<parallel>], iteration_bounds = array<i64: 1>, scalar_prefetch = 0 : i64, scratch_operands = 0 : i64, tpu.core_type = #tpu.core_type<tc>, window_params = [{transform_indices = @transform_0, window_bounds = array<i64: 392, 32>}, {pipeline_mode = #tpu.pipeline_mode<synchronous>, transform_indices = @transform_1, window_bounds = array<i64: 32, 64>}, {pipeline_mode = #tpu.pipeline_mode<synchronous>, transform_indices = @transform_2, window_bounds = array<i64: 1, 64>}, {transform_indices = @transform_3, window_bounds = array<i64: 392, 64>}]} {
    %c0 = arith.constant 0 : index
    %c0_0 = arith.constant 0 : index
    %0 = vector.load %arg1[%c0, %c0_0] : memref<392x32xbf16, #tpu.memory_space<vmem>>, vector<392x32xbf16>
    %c0_1 = arith.constant 0 : index
    %c0_2 = arith.constant 0 : index
    %1 = vector.load %arg2[%c0_1, %c0_2] : memref<32x64xbf16, #tpu.memory_space<vmem>>, vector<32x64xbf16>
    %cst = arith.constant dense<0.000000e+00> : vector<392x64xf32>
    %2 = tpu.matmul %0, %1, %cst {dimension_numbers = #tpu.dot_dimension_numbers<[1], [0], [0], [1], [0, 0, 1, 1], [], []>} : vector<392x32xbf16>, vector<32x64xbf16>, vector<392x64xf32> -> vector<392x64xf32>
    %c0_3 = arith.constant 0 : index
    %c0_4 = arith.constant 0 : index
    %3 = vector.load %arg3[%c0_3, %c0_4] : memref<1x64xf32, #tpu.memory_space<vmem>>, vector<1x64xf32>
    %4 = vector.broadcast %3 : vector<1x64xf32> to vector<392x64xf32>
    %5 = arith.addf %2, %4 : vector<392x64xf32>
    %6 = arith.truncf %5 : vector<392x64xf32> to vector<392x64xbf16>
    %c0_5 = arith.constant 0 : index
    %c0_6 = arith.constant 0 : index
    %7 = vector.load %arg4[%c0_5, %c0_6] : memref<392x64xbf16, #tpu.memory_space<vmem>>, vector<392x64xbf16>
    tpu.vector_store %arg4[%c0_5, %c0_6], %6 {strides = array<i32>} : memref<392x64xbf16, #tpu.memory_space<vmem>>, vector<392x64xbf16>,
    return
  }
  func.func @transform_0(%arg0: i32) -> (i32, i32) {
    %c0_i32 = arith.constant 0 : i32
    %c0_i32_0 = arith.constant 0 : i32
    return %arg0, %c0_i32 : i32, i32
  }
  func.func @transform_1(%arg0: i32) -> (i32, i32) {
    %c0_i32 = arith.constant 0 : i32
    %c0_i32_0 = arith.constant 0 : i32
    %c0_i32_1 = arith.constant 0 : i32
    return %c0_i32, %c0_i32_0 : i32, i32
  }
  func.func @transform_2(%arg0: i32) -> (i32, i32) {
    %c0_i32 = arith.constant 0 : i32
    %c0_i32_0 = arith.constant 0 : i32
    %c0_i32_1 = arith.constant 0 : i32
    return %c0_i32, %c0_i32_0 : i32, i32
  }
  func.func @transform_3(%arg0: i32) -> (i32, i32) {
    %c0_i32 = arith.constant 0 : i32
    %c0_i32_0 = arith.constant 0 : i32
    return %arg0, %c0_i32 : i32, i32
  }
}

module attributes {stable_mosaic.version = 11 : i64} {
  func.func @_maxpool_relu_kernel(%arg0: i32, %arg1: memref<14x2x7x128xbf16, #tpu.memory_space<vmem>>, %arg2: memref<14x7x64xbf16, #tpu.memory_space<vmem>>) attributes {dimension_semantics = [#tpu.dimension_semantics<parallel>], iteration_bounds = array<i64: 1>, scalar_prefetch = 0 : i64, scratch_operands = 0 : i64, tpu.core_type = #tpu.core_type<tc>, window_params = [{transform_indices = @transform_0, window_bounds = array<i64: 14, 2, 7, 128>}, {transform_indices = @transform_1, window_bounds = array<i64: 14, 7, 64>}]} {
    %c0 = arith.constant 0 : index
    %c0_0 = arith.constant 0 : index
    %c0_1 = arith.constant 0 : index
    %c0_2 = arith.constant 0 : index
    %0 = vector.load %arg1[%c0, %c0_0, %c0_1, %c0_2] : memref<14x2x7x128xbf16, #tpu.memory_space<vmem>>, vector<14x1x7x128xbf16>
    %1 = vector.shape_cast %0 : vector<14x1x7x128xbf16> to vector<14x7x128xbf16>
    %c0_3 = arith.constant 0 : index
    %c1 = arith.constant 1 : index
    %c0_4 = arith.constant 0 : index
    %c0_5 = arith.constant 0 : index
    %2 = vector.load %arg1[%c0_3, %c1, %c0_4, %c0_5] : memref<14x2x7x128xbf16, #tpu.memory_space<vmem>>, vector<14x1x7x128xbf16>
    %3 = vector.shape_cast %2 : vector<14x1x7x128xbf16> to vector<14x7x128xbf16>
    %4 = arith.maximumf %1, %3 : vector<14x7x128xbf16>
    %5 = vector.extract_strided_slice %4 {offsets = [0, 0, 0], sizes = [14, 7, 64], strides = [1, 1, 1]} : vector<14x7x128xbf16> to vector<14x7x64xbf16>
    %6 = vector.extract_strided_slice %4 {offsets = [0, 0, 64], sizes = [14, 7, 64], strides = [1, 1, 1]} : vector<14x7x128xbf16> to vector<14x7x64xbf16>
    %7 = arith.maximumf %5, %6 : vector<14x7x64xbf16>
    %cst = arith.constant 0.000000e+00 : bf16
    %8 = vector.broadcast %cst : bf16 to vector<14x7x64xbf16>
    %9 = arith.maximumf %7, %8 : vector<14x7x64xbf16>
    %c0_6 = arith.constant 0 : index
    %c0_7 = arith.constant 0 : index
    %c0_8 = arith.constant 0 : index
    %10 = vector.load %arg2[%c0_6, %c0_7, %c0_8] : memref<14x7x64xbf16, #tpu.memory_space<vmem>>, vector<14x7x64xbf16>
    tpu.vector_store %arg2[%c0_6, %c0_7, %c0_8], %9 {strides = array<i32>} : memref<14x7x64xbf16, #tpu.memory_space<vmem>>, vector<14x7x64xbf16>,
    return
  }
  func.func @transform_0(%arg0: i32) -> (i32, i32, i32, i32) {
    %c0_i32 = arith.constant 0 : i32
    %c0_i32_0 = arith.constant 0 : i32
    %c0_i32_1 = arith.constant 0 : i32
    %c0_i32_2 = arith.constant 0 : i32
    return %arg0, %c0_i32, %c0_i32_0, %c0_i32_1 : i32, i32, i32, i32
  }
  func.func @transform_1(%arg0: i32) -> (i32, i32, i32) {
    %c0_i32 = arith.constant 0 : i32
    %c0_i32_0 = arith.constant 0 : i32
    %c0_i32_1 = arith.constant 0 : i32
    return %arg0, %c0_i32, %c0_i32_0 : i32, i32, i32
  }
}

module attributes {stable_mosaic.version = 11 : i64} {
  func.func @_matmul_bias_kernel(%arg0: i32, %arg1: memref<32x1600xbf16, #tpu.memory_space<vmem>>, %arg2: memref<1600x128xbf16, #tpu.memory_space<vmem>>, %arg3: memref<1x128xf32, #tpu.memory_space<vmem>>, %arg4: memref<32x128xbf16, #tpu.memory_space<vmem>>) attributes {dimension_semantics = [#tpu.dimension_semantics<parallel>], iteration_bounds = array<i64: 1>, scalar_prefetch = 0 : i64, scratch_operands = 0 : i64, tpu.core_type = #tpu.core_type<tc>, window_params = [{transform_indices = @transform_0, window_bounds = array<i64: 32, 1600>}, {pipeline_mode = #tpu.pipeline_mode<synchronous>, transform_indices = @transform_1, window_bounds = array<i64: 1600, 128>}, {pipeline_mode = #tpu.pipeline_mode<synchronous>, transform_indices = @transform_2, window_bounds = array<i64: 1, 128>}, {transform_indices = @transform_3, window_bounds = array<i64: 32, 128>}]} {
    %c0 = arith.constant 0 : index
    %c0_0 = arith.constant 0 : index
    %0 = vector.load %arg1[%c0, %c0_0] : memref<32x1600xbf16, #tpu.memory_space<vmem>>, vector<32x1600xbf16>
    %c0_1 = arith.constant 0 : index
    %c0_2 = arith.constant 0 : index
    %1 = vector.load %arg2[%c0_1, %c0_2] : memref<1600x128xbf16, #tpu.memory_space<vmem>>, vector<1600x128xbf16>
    %cst = arith.constant dense<0.000000e+00> : vector<32x128xf32>
    %2 = tpu.matmul %0, %1, %cst {dimension_numbers = #tpu.dot_dimension_numbers<[1], [0], [0], [1], [0, 0, 1, 1], [], []>} : vector<32x1600xbf16>, vector<1600x128xbf16>, vector<32x128xf32> -> vector<32x128xf32>
    %c0_3 = arith.constant 0 : index
    %c0_4 = arith.constant 0 : index
    %3 = vector.load %arg3[%c0_3, %c0_4] : memref<1x128xf32, #tpu.memory_space<vmem>>, vector<1x128xf32>
    %4 = vector.broadcast %3 : vector<1x128xf32> to vector<32x128xf32>
    %5 = arith.addf %2, %4 : vector<32x128xf32>
    %6 = arith.truncf %5 : vector<32x128xf32> to vector<32x128xbf16>
    %c0_5 = arith.constant 0 : index
    %c0_6 = arith.constant 0 : index
    %7 = vector.load %arg4[%c0_5, %c0_6] : memref<32x128xbf16, #tpu.memory_space<vmem>>, vector<32x128xbf16>
    tpu.vector_store %arg4[%c0_5, %c0_6], %6 {strides = array<i32>} : memref<32x128xbf16, #tpu.memory_space<vmem>>, vector<32x128xbf16>,
    return
  }
  func.func @transform_0(%arg0: i32) -> (i32, i32) {
    %c0_i32 = arith.constant 0 : i32
    %c0_i32_0 = arith.constant 0 : i32
    return %arg0, %c0_i32 : i32, i32
  }
  func.func @transform_1(%arg0: i32) -> (i32, i32) {
    %c0_i32 = arith.constant 0 : i32
    %c0_i32_0 = arith.constant 0 : i32
    %c0_i32_1 = arith.constant 0 : i32
    return %c0_i32, %c0_i32_0 : i32, i32
  }
  func.func @transform_2(%arg0: i32) -> (i32, i32) {
    %c0_i32 = arith.constant 0 : i32
    %c0_i32_0 = arith.constant 0 : i32
    %c0_i32_1 = arith.constant 0 : i32
    return %c0_i32, %c0_i32_0 : i32, i32
  }
  func.func @transform_3(%arg0: i32) -> (i32, i32) {
    %c0_i32 = arith.constant 0 : i32
    %c0_i32_0 = arith.constant 0 : i32
    return %arg0, %c0_i32 : i32, i32
  }
}

module attributes {stable_mosaic.version = 11 : i64} {
  func.func @_maxpool_relu_kernel(%arg0: i32, %arg1: memref<4x2x2x256xbf16, #tpu.memory_space<vmem>>, %arg2: memref<4x2x128xbf16, #tpu.memory_space<vmem>>) attributes {dimension_semantics = [#tpu.dimension_semantics<parallel>], iteration_bounds = array<i64: 1>, scalar_prefetch = 0 : i64, scratch_operands = 0 : i64, tpu.core_type = #tpu.core_type<tc>, window_params = [{transform_indices = @transform_0, window_bounds = array<i64: 4, 2, 2, 256>}, {transform_indices = @transform_1, window_bounds = array<i64: 4, 2, 128>}]} {
    %c0 = arith.constant 0 : index
    %c0_0 = arith.constant 0 : index
    %c0_1 = arith.constant 0 : index
    %c0_2 = arith.constant 0 : index
    %0 = vector.load %arg1[%c0, %c0_0, %c0_1, %c0_2] : memref<4x2x2x256xbf16, #tpu.memory_space<vmem>>, vector<4x1x2x256xbf16>
    %1 = vector.shape_cast %0 : vector<4x1x2x256xbf16> to vector<4x2x256xbf16>
    %c0_3 = arith.constant 0 : index
    %c1 = arith.constant 1 : index
    %c0_4 = arith.constant 0 : index
    %c0_5 = arith.constant 0 : index
    %2 = vector.load %arg1[%c0_3, %c1, %c0_4, %c0_5] : memref<4x2x2x256xbf16, #tpu.memory_space<vmem>>, vector<4x1x2x256xbf16>
    %3 = vector.shape_cast %2 : vector<4x1x2x256xbf16> to vector<4x2x256xbf16>
    %4 = arith.maximumf %1, %3 : vector<4x2x256xbf16>
    %5 = vector.extract_strided_slice %4 {offsets = [0, 0, 0], sizes = [4, 2, 128], strides = [1, 1, 1]} : vector<4x2x256xbf16> to vector<4x2x128xbf16>
    %6 = vector.extract_strided_slice %4 {offsets = [0, 0, 128], sizes = [4, 2, 128], strides = [1, 1, 1]} : vector<4x2x256xbf16> to vector<4x2x128xbf16>
    %7 = arith.maximumf %5, %6 : vector<4x2x128xbf16>
    %cst = arith.constant 0.000000e+00 : bf16
    %8 = vector.broadcast %cst : bf16 to vector<4x2x128xbf16>
    %9 = arith.maximumf %7, %8 : vector<4x2x128xbf16>
    %c0_6 = arith.constant 0 : index
    %c0_7 = arith.constant 0 : index
    %c0_8 = arith.constant 0 : index
    %10 = vector.load %arg2[%c0_6, %c0_7, %c0_8] : memref<4x2x128xbf16, #tpu.memory_space<vmem>>, vector<4x2x128xbf16>
    tpu.vector_store %arg2[%c0_6, %c0_7, %c0_8], %9 {strides = array<i32>} : memref<4x2x128xbf16, #tpu.memory_space<vmem>>, vector<4x2x128xbf16>,
    return
  }
  func.func @transform_0(%arg0: i32) -> (i32, i32, i32, i32) {
    %c0_i32 = arith.constant 0 : i32
    %c0_i32_0 = arith.constant 0 : i32
    %c0_i32_1 = arith.constant 0 : i32
    %c0_i32_2 = arith.constant 0 : i32
    return %arg0, %c0_i32, %c0_i32_0, %c0_i32_1 : i32, i32, i32, i32
  }
  func.func @transform_1(%arg0: i32) -> (i32, i32, i32) {
    %c0_i32 = arith.constant 0 : i32
    %c0_i32_0 = arith.constant 0 : i32
    %c0_i32_1 = arith.constant 0 : i32
    return %arg0, %c0_i32, %c0_i32_0 : i32, i32, i32
  }
}

module attributes {stable_mosaic.version = 11 : i64} {
  func.func @_head_kernel(%arg0: i32, %arg1: memref<2x512xbf16, #tpu.memory_space<vmem>>, %arg2: memref<512x256xbf16, #tpu.memory_space<vmem>>, %arg3: memref<1x256xf32, #tpu.memory_space<vmem>>, %arg4: memref<256x128xbf16, #tpu.memory_space<vmem>>, %arg5: memref<1x128xf32, #tpu.memory_space<vmem>>, %arg6: memref<128x128xbf16, #tpu.memory_space<vmem>>, %arg7: memref<1x128xf32, #tpu.memory_space<vmem>>, %arg8: memref<2x128xf32, #tpu.memory_space<vmem>>) attributes {dimension_semantics = [#tpu.dimension_semantics<parallel>], iteration_bounds = array<i64: 1>, scalar_prefetch = 0 : i64, scratch_operands = 0 : i64, tpu.core_type = #tpu.core_type<tc>, window_params = [{transform_indices = @transform_0, window_bounds = array<i64: 2, 512>}, {pipeline_mode = #tpu.pipeline_mode<synchronous>, transform_indices = @transform_1, window_bounds = array<i64: 512, 256>}, {pipeline_mode = #tpu.pipeline_mode<synchronous>, transform_indices = @transform_2, window_bounds = array<i64: 1, 256>}, {pipeline_mode = #tpu.pipeline_mode<synchronous>, transform_indices = @transform_3, window_bounds = array<i64: 256, 128>}, {pipeline_mode = #tpu.pipeline_mode<synchronous>, transform_indices = @transform_4, window_bounds = array<i64: 1, 128>}, {pipeline_mode = #tpu.pipeline_mode<synchronous>, transform_indices = @transform_5, window_bounds = array<i64: 128, 128>}, {pipeline_mode = #tpu.pipeline_mode<synchronous>, transform_indices = @transform_6, window_bounds = array<i64: 1, 128>}, {transform_indices = @transform_7, window_bounds = array<i64: 2, 128>}]} {
    %c0 = arith.constant 0 : index
    %c0_0 = arith.constant 0 : index
    %0 = vector.load %arg1[%c0, %c0_0] : memref<2x512xbf16, #tpu.memory_space<vmem>>, vector<2x512xbf16>
    %c0_1 = arith.constant 0 : index
    %c0_2 = arith.constant 0 : index
    %1 = vector.load %arg2[%c0_1, %c0_2] : memref<512x256xbf16, #tpu.memory_space<vmem>>, vector<512x256xbf16>
    %cst = arith.constant dense<0.000000e+00> : vector<2x256xf32>
    %2 = tpu.matmul %0, %1, %cst {dimension_numbers = #tpu.dot_dimension_numbers<[1], [0], [0], [1], [0, 0, 1, 1], [], []>} : vector<2x512xbf16>, vector<512x256xbf16>, vector<2x256xf32> -> vector<2x256xf32>
    %c0_3 = arith.constant 0 : index
    %c0_4 = arith.constant 0 : index
    %3 = vector.load %arg3[%c0_3, %c0_4] : memref<1x256xf32, #tpu.memory_space<vmem>>, vector<1x256xf32>
    %4 = vector.broadcast %3 : vector<1x256xf32> to vector<2x256xf32>
    %5 = arith.addf %2, %4 : vector<2x256xf32>
    %cst_5 = arith.constant 0.000000e+00 : f32
    %6 = vector.broadcast %cst_5 : f32 to vector<2x256xf32>
    %7 = arith.maximumf %5, %6 : vector<2x256xf32>
    %8 = arith.truncf %7 : vector<2x256xf32> to vector<2x256xbf16>
    %c0_6 = arith.constant 0 : index
    %c0_7 = arith.constant 0 : index
    %9 = vector.load %arg4[%c0_6, %c0_7] : memref<256x128xbf16, #tpu.memory_space<vmem>>, vector<256x128xbf16>
    %cst_8 = arith.constant dense<0.000000e+00> : vector<2x128xf32>
    %10 = tpu.matmul %8, %9, %cst_8 {dimension_numbers = #tpu.dot_dimension_numbers<[1], [0], [0], [1], [0, 0, 1, 1], [], []>} : vector<2x256xbf16>, vector<256x128xbf16>, vector<2x128xf32> -> vector<2x128xf32>
    %c0_9 = arith.constant 0 : index
    %c0_10 = arith.constant 0 : index
    %11 = vector.load %arg5[%c0_9, %c0_10] : memref<1x128xf32, #tpu.memory_space<vmem>>, vector<1x128xf32>
    %12 = vector.broadcast %11 : vector<1x128xf32> to vector<2x128xf32>
    %13 = arith.addf %10, %12 : vector<2x128xf32>
    %cst_11 = arith.constant 0.000000e+00 : f32
    %14 = vector.broadcast %cst_11 : f32 to vector<2x128xf32>
    %15 = arith.maximumf %13, %14 : vector<2x128xf32>
    %16 = arith.truncf %15 : vector<2x128xf32> to vector<2x128xbf16>
    %c0_12 = arith.constant 0 : index
    %c0_13 = arith.constant 0 : index
    %17 = vector.load %arg6[%c0_12, %c0_13] : memref<128x128xbf16, #tpu.memory_space<vmem>>, vector<128x128xbf16>
    %cst_14 = arith.constant dense<0.000000e+00> : vector<2x128xf32>
    %18 = tpu.matmul %16, %17, %cst_14 {dimension_numbers = #tpu.dot_dimension_numbers<[1], [0], [0], [1], [0, 0, 1, 1], [], []>} : vector<2x128xbf16>, vector<128x128xbf16>, vector<2x128xf32> -> vector<2x128xf32>
    %c0_15 = arith.constant 0 : index
    %c0_16 = arith.constant 0 : index
    %19 = vector.load %arg7[%c0_15, %c0_16] : memref<1x128xf32, #tpu.memory_space<vmem>>, vector<1x128xf32>
    %20 = vector.broadcast %19 : vector<1x128xf32> to vector<2x128xf32>
    %21 = arith.addf %18, %20 : vector<2x128xf32>
    %22 = tpu.iota {dimensions = array<i32: 1>} : vector<2x128xi32>
    %c10_i32 = arith.constant 10 : i32
    %23 = vector.broadcast %c10_i32 : i32 to vector<2x128xi32>
    %24 = arith.cmpi slt, %22, %23 : vector<2x128xi32>
    %cst_17 = arith.constant -1.000000e+30 : f32
    %25 = vector.broadcast %cst_17 : f32 to vector<2x128xf32>
    %26 = arith.select %24, %21, %25 : vector<2x128xi1>, vector<2x128xf32>
    %cst_18 = arith.constant dense<0xFF800000> : vector<2xf32>
    %27 = vector.multi_reduction <maximumf>, %26, %cst_18 [1] : vector<2x128xf32> to vector<2xf32>
    %28 = vector.shape_cast %27 : vector<2xf32> to vector<2x1xf32>
    %29 = vector.broadcast %28 : vector<2x1xf32> to vector<2x128xf32>
    %30 = arith.subf %26, %29 : vector<2x128xf32>
    %31 = math.exp %30 : vector<2x128xf32>
    %cst_19 = arith.constant dense<0.000000e+00> : vector<2xf32>
    %32 = vector.multi_reduction <add>, %31, %cst_19 [1] : vector<2x128xf32> to vector<2xf32>
    %33 = vector.shape_cast %32 : vector<2xf32> to vector<2x1xf32>
    %34 = math.log %33 : vector<2x1xf32>
    %35 = vector.broadcast %34 : vector<2x1xf32> to vector<2x128xf32>
    %36 = arith.subf %30, %35 : vector<2x128xf32>
    %c0_20 = arith.constant 0 : index
    %c0_21 = arith.constant 0 : index
    %37 = vector.load %arg8[%c0_20, %c0_21] : memref<2x128xf32, #tpu.memory_space<vmem>>, vector<2x128xf32>
    tpu.vector_store %arg8[%c0_20, %c0_21], %36 {strides = array<i32>} : memref<2x128xf32, #tpu.memory_space<vmem>>, vector<2x128xf32>,
    return
  }
  func.func @transform_0(%arg0: i32) -> (i32, i32) {
    %c0_i32 = arith.constant 0 : i32
    %c0_i32_0 = arith.constant 0 : i32
    return %arg0, %c0_i32 : i32, i32
  }
  func.func @transform_1(%arg0: i32) -> (i32, i32) {
    %c0_i32 = arith.constant 0 : i32
    %c0_i32_0 = arith.constant 0 : i32
    %c0_i32_1 = arith.constant 0 : i32
    return %c0_i32, %c0_i32_0 : i32, i32
  }
  func.func @transform_2(%arg0: i32) -> (i32, i32) {
    %c0_i32 = arith.constant 0 : i32
    %c0_i32_0 = arith.constant 0 : i32
    %c0_i32_1 = arith.constant 0 : i32
    return %c0_i32, %c0_i32_0 : i32, i32
  }
  func.func @transform_3(%arg0: i32) -> (i32, i32) {
    %c0_i32 = arith.constant 0 : i32
    %c0_i32_0 = arith.constant 0 : i32
    %c0_i32_1 = arith.constant 0 : i32
    return %c0_i32, %c0_i32_0 : i32, i32
  }
  func.func @transform_4(%arg0: i32) -> (i32, i32) {
    %c0_i32 = arith.constant 0 : i32
    %c0_i32_0 = arith.constant 0 : i32
    %c0_i32_1 = arith.constant 0 : i32
    return %c0_i32, %c0_i32_0 : i32, i32
  }
  func.func @transform_5(%arg0: i32) -> (i32, i32) {
    %c0_i32 = arith.constant 0 : i32
    %c0_i32_0 = arith.constant 0 : i32
    %c0_i32_1 = arith.constant 0 : i32
    return %c0_i32, %c0_i32_0 : i32, i32
  }
  func.func @transform_6(%arg0: i32) -> (i32, i32) {
    %c0_i32 = arith.constant 0 : i32
    %c0_i32_0 = arith.constant 0 : i32
    %c0_i32_1 = arith.constant 0 : i32
    return %c0_i32, %c0_i32_0 : i32, i32
  }
  func.func @transform_7(%arg0: i32) -> (i32, i32) {
    %c0_i32 = arith.constant 0 : i32
    %c0_i32_0 = arith.constant 0 : i32
    return %arg0, %c0_i32 : i32, i32
  }
}

</mosaic_0001>

<bundles_post_ra>
// kernel: net_forward.6
= control target key start
LH: loop header
LB: loop body
LE: loop exit
PB: predicated region body
PF: predicated region fallthrough
CT: control target
= control target key end

     0   :  { %s201_s22 = smov 64   ;;  %vm136_vm0 = vcmask 519168   ;;  %vm137_vm1 = vsmask.f32 3328  ;;  %v202_v48 = vmov 0   ;;  %s497_s0 = inlined_call_operand.vmem [shape: bf16[14,2,7,128], index: 0, kind: input, shape index: {}]   ;;  %s498_s1 = inlined_call_operand.vmem [shape: bf16[14,7,64], index: 1, kind: output, shape index: {}]  }
   0x1   :  { %v11_v0 = vld [vmem:[%s497_s0 + $0x10] sm:$0xf]  ;;  %v187_v1 = vld [vmem:[%s497_s0 + $0x14] sm:$0xf]  ;;  %v9_v2 = vld [vmem:[%s497_s0] sm:$0xf] }
   0x2   :  { %v222_v3 = vmax.bf16 %v187_v1, %v11_v0  ;;  %v185_v4 = vld [vmem:[%s497_s0 + $0x4] sm:$0xf]  ;;  %v12_v5 = vld [vmem:[%s497_s0 + $0x18] sm:$0xf]  ;;  %v188_v6 = vld [vmem:[%s497_s0 + $0x1c] sm:$0xf] }
   0x3   :  { %v233_v7 = vmax.bf16 %v185_v4, %v9_v2  ;;  %v10_v8 = vld [vmem:[%s497_s0 + $0x8] sm:$0xf]  ;;  %v186_v9 = vld [vmem:[%s497_s0 + $0xc] sm:$0xf]  ;;  %v243_v10 = vmax.bf16 %v188_v6, %v12_v5  ;;  %v13_v14 = vld [vmem:[%s497_s0 + $0x20] sm:$0xf] }
   0x4   :  { %70 = vrot.lane.b32.xlu1 %v222_v3, %s201_s22  ;;  %v247_v11 = vmax.bf16 %v186_v9, %v10_v8  ;;  %v14_v12 = vld [vmem:[%s497_s0 + $0x28] sm:$0xf]  ;;  %v190_v13 = vld [vmem:[%s497_s0 + $0x2c] sm:$0xf]  ;;  %v189_v15 = vld [vmem:[%s497_s0 + $0x24] sm:$0xf] }
   0x5   :  { %66 = vrot.lane.b32.xlu0 %v233_v7, %s201_s22  ;;  %v263_v16 = vmax.bf16 %v190_v13, %v14_v12  ;;  %v267_v17 = vmax.bf16 %v189_v15, %v13_v14  ;;  %v16_v18 = vld [vmem:[%s497_s0 + $0x38] sm:$0xf]  ;;  %v192_v19 = vld [vmem:[%s497_s0 + $0x3c] sm:$0xf]  ;;  %v15_v20 = vld [vmem:[%s497_s0 + $0x30] sm:$0xf] }
   0x6   :  { %v191_v21 = vld [vmem:[%s497_s0 + $0x34] sm:$0xf]  ;;  %v283_v22 = vmax.bf16 %v192_v19, %v16_v18  ;;  %v18_v24 = vld [vmem:[%s497_s0 + $0x48] sm:$0xf]  ;;  %v194_v25 = vld [vmem:[%s497_s0 + $0x4c] sm:$0xf] }
   0x7   :  { %v287_v23 = vmax.bf16 %v191_v21, %v15_v20  ;;  %v17_v26 = vld [vmem:[%s497_s0 + $0x40] sm:$0xf]  ;;  %v193_v27 = vld [vmem:[%s497_s0 + $0x44] sm:$0xf]  ;;  %v303_v28 = vmax.bf16 %v194_v25, %v18_v24  ;;  %v20_v30 = vld [vmem:[%s497_s0 + $0x58] sm:$0xf] }
   0x8   :  { %72 = vrot.lane.b32.xlu1 %v243_v10, %s201_s22  ;;  %v307_v29 = vmax.bf16 %v193_v27, %v17_v26  ;;  %v196_v31 = vld [vmem:[%s497_s0 + $0x5c] sm:$0xf]  ;;  %v19_v32 = vld [vmem:[%s497_s0 + $0x50] sm:$0xf]  ;;  %v195_v33 = vld [vmem:[%s497_s0 + $0x54] sm:$0xf] }
   0x9   :  { %68 = vrot.lane.b32.xlu0 %v247_v11, %s201_s22  ;;  %v323_v34 = vmax.bf16 %v196_v31, %v20_v30  ;;  %v327_v35 = vmax.bf16 %v195_v33, %v19_v32  ;;  %v22_v36 = vld [vmem:[%s497_s0 + $0x68] sm:$0xf]  ;;  %v198_v37 = vld [vmem:[%s497_s0 + $0x6c] sm:$0xf]  ;;  %v21_v38 = vld [vmem:[%s497_s0 + $0x60] sm:$0xf] }
   0xa   :  { %v197_v39 = vld [vmem:[%s497_s0 + $0x64] sm:$0xf]  ;;  %v343_v40 = vmax.bf16 %v198_v37, %v22_v36  ;;  %vm354_vm2 = vmand %vm136_vm0, %vm137_vm1  ;;  %v145_v46 = vld [vmem:[%s498_s1 + $0x8] sm:$0xf] }
   0xb   :  { %v347_v41 = vmax.bf16 %v197_v39, %v21_v38  ;;  %v139_v50 = vld [vmem:[%s498_s1] sm:$0xf]  ;;  %v148_v57 = vld [vmem:[%s498_s1 + $0xc] sm:$0xf]  ;;  %v142_v60 = vld [vmem:[%s498_s1 + $0x4] sm:$0xf] }
   0xc   :  { %76 = vrot.lane.b32.xlu1 %v263_v16, %s201_s22  ;;  %v151_v6 = vld [vmem:[%s498_s1 + $0x10] sm:$0xf]  ;;  %v160_v13 = vld [vmem:[%s498_s1 + $0x1c] sm:$0xf]  ;;  %v163_v26 = vld [vmem:[%s498_s1 + $0x20] sm:$0xf] }
   0xd   :  { %74 = vrot.lane.b32.xlu0 %v267_v17, %s201_s22  ;;  %v172_v33 = vld [vmem:[%s498_s1 + $0x2c] sm:$0xf]  ;;  %v169_v37 = vld [vmem:[%s498_s1 + $0x28] sm:$0xf] }
  0x10   :  { %80 = vrot.lane.b32.xlu1 %v283_v22, %s201_s22 }
  0x11   :  { %78 = vrot.lane.b32.xlu0 %v287_v23, %s201_s22 }
  0x14   :  { %84 = vrot.lane.b32.xlu1 %v303_v28, %s201_s22 }
  0x15   :  { %82 = vrot.lane.b32.xlu0 %v307_v29, %s201_s22 }
  0x18   :  { %88 = vrot.lane.b32.xlu1 %v323_v34, %s201_s22 }
  0x19   :  { %86 = vrot.lane.b32.xlu0 %v327_v35, %s201_s22 }
  0x1c   :  { %92 = vrot.lane.b32.xlu1 %v343_v40, %s201_s22 }
  0x1d   :  { %90 = vrot.lane.b32.xlu0 %v347_v41, %s201_s22 }
  0x76   :  { %v71_v42 = vpop.permute.xlu1 %70 }
  0x77   :  { %v110_v43 = vmax.bf16 %v71_v42, %v222_v3  ;;  %v67_v44 = vpop.permute.xlu0 %66  ;;  %v154_v3 = vld [vmem:[%s498_s1 + $0x14] sm:$0xf] }
  0x78   :  { %v108_v47 = vmax.bf16 %v67_v44, %v233_v7 }
  0x79   :  { %v124_v49 = vmax.bf16 %v202_v48, %v110_v43 }
  0x7a   :  { %v122_v51 = vmax.bf16 %v202_v48, %v108_v47  ;;  %v73_v52 = vpop.permute.xlu1 %72 }
  0x7b   :  { %v146_v53 = vsel %vm354_vm2, %v124_v49, %v145_v46  ;;  %v111_v54 = vmax.bf16 %v73_v52, %v243_v10  ;;  %v69_v55 = vpop.permute.xlu0 %68  ;;  %v178_v46 = vld [vmem:[%s498_s1 + $0x34] sm:$0xf]  ;;  %v175_v49 = vld [vmem:[%s498_s1 + $0x30] sm:$0xf] }
  0x7c   :  { %147 = vst [vmem:[%s498_s1 + $0x8] sm:$0xf] %v146_v53  ;;  %v140_v56 = vsel %vm354_vm2, %v122_v51, %v139_v50  ;;  %v109_v58 = vmax.bf16 %v69_v55, %v247_v11 }
  0x7d   :  { %141 = vst [vmem:[%s498_s1] sm:$0xf] %v140_v56  ;;  %v125_v59 = vmax.bf16 %v202_v48, %v111_v54 }
  0x7e   :  { %v123_v61 = vmax.bf16 %v202_v48, %v109_v58  ;;  %v77_v62 = vpop.permute.xlu1 %76 }
  0x7f   :  { %v149_v63 = vsel %vm354_vm2, %v125_v59, %v148_v57  ;;  %v113_v0 = vmax.bf16 %v77_v62, %v263_v16  ;;  %v75_v1 = vpop.permute.xlu0 %74  ;;  %v157_v16 = vld [vmem:[%s498_s1 + $0x18] sm:$0xf] }
  0x80   :  { %150 = vst [vmem:[%s498_s1 + $0xc] sm:$0xf] %v149_v63  ;;  %v143_v2 = vsel %vm354_vm2, %v123_v61, %v142_v60  ;;  %v112_v4 = vmax.bf16 %v75_v1, %v267_v17 }
  0x81   :  { %144 = vst [vmem:[%s498_s1 + $0x4] sm:$0xf] %v143_v2  ;;  %v127_v5 = vmax.bf16 %v202_v48, %v113_v0 }
  0x82   :  { %v126_v7 = vmax.bf16 %v202_v48, %v112_v4  ;;  %v81_v8 = vpop.permute.xlu1 %80 }
  0x83   :  { %v155_v9 = vsel %vm354_vm2, %v127_v5, %v154_v3  ;;  %v115_v10 = vmax.bf16 %v81_v8, %v283_v22  ;;  %v79_v11 = vpop.permute.xlu0 %78 }
  0x84   :  { %156 = vst [vmem:[%s498_s1 + $0x14] sm:$0xf] %v155_v9  ;;  %v152_v12 = vsel %vm354_vm2, %v126_v7, %v151_v6  ;;  %v114_v14 = vmax.bf16 %v79_v11, %v287_v23  ;;  %v166_v23 = vld [vmem:[%s498_s1 + $0x24] sm:$0xf] }
  0x85   :  { %153 = vst [vmem:[%s498_s1 + $0x10] sm:$0xf] %v152_v12  ;;  %v129_v15 = vmax.bf16 %v202_v48, %v115_v10 }
  0x86   :  { %v128_v17 = vmax.bf16 %v202_v48, %v114_v14  ;;  %v85_v18 = vpop.permute.xlu1 %84 }
  0x87   :  { %v161_v19 = vsel %vm354_vm2, %v129_v15, %v160_v13  ;;  %v117_v20 = vmax.bf16 %v85_v18, %v303_v28  ;;  %v83_v21 = vpop.permute.xlu0 %82 }
  0x88   :  { %162 = vst [vmem:[%s498_s1 + $0x1c] sm:$0xf] %v161_v19  ;;  %v158_v22 = vsel %vm354_vm2, %v128_v17, %v157_v16  ;;  %v116_v24 = vmax.bf16 %v83_v21, %v307_v29 }
  0x89   :  { %159 = vst [vmem:[%s498_s1 + $0x18] sm:$0xf] %v158_v22  ;;  %v131_v25 = vmax.bf16 %v202_v48, %v117_v20 }
  0x8a   :  { %v130_v27 = vmax.bf16 %v202_v48, %v116_v24  ;;  %v89_v28 = vpop.permute.xlu1 %88 }
  0x8b   :  { %v167_v30 = vsel %vm354_vm2, %v131_v25, %v166_v23  ;;  %v119_v31 = vmax.bf16 %v89_v28, %v323_v34  ;;  %v87_v32 = vpop.permute.xlu0 %86 }
  0x8c   :  { %168 = vst [vmem:[%s498_s1 + $0x24] sm:$0xf] %v167_v30  ;;  %v164_v29 = vsel %vm354_vm2, %v130_v27, %v163_v26  ;;  %v118_v36 = vmax.bf16 %v87_v32, %v327_v35 }
  0x8d   :  { %165 = vst [vmem:[%s498_s1 + $0x20] sm:$0xf] %v164_v29  ;;  %v133_v34 = vmax.bf16 %v202_v48, %v119_v31 }
  0x8e   :  { %v132_v38 = vmax.bf16 %v202_v48, %v118_v36  ;;  %v93_v39 = vpop.permute.xlu1 %92 }
  0x8f   :  { %v173_v42 = vsel %vm354_vm2, %v133_v34, %v172_v33  ;;  %v121_v43 = vmax.bf16 %v93_v39, %v343_v40  ;;  %v91_v44 = vpop.permute.xlu0 %90 }
  0x90   :  { %174 = vst [vmem:[%s498_s1 + $0x2c] sm:$0xf] %v173_v42  ;;  %v170_v35 = vsel %vm354_vm2, %v132_v38, %v169_v37  ;;  %v120_v47 = vmax.bf16 %v91_v44, %v347_v41 }
  0x91   :  { %171 = vst [vmem:[%s498_s1 + $0x28] sm:$0xf] %v170_v35  ;;  %v135_v40 = vmax.bf16 %v202_v48, %v121_v43 }
  0x92   :  { %v134_v50 = vmax.bf16 %v202_v48, %v120_v47 }
  0x93   :  { %v179_v51 = vsel %vm354_vm2, %v135_v40, %v178_v46 }
  0x94   :  { %180 = vst [vmem:[%s498_s1 + $0x34] sm:$0xf] %v179_v51  ;;  %v176_v41 = vsel %vm354_vm2, %v134_v50, %v175_v49 }
  0x95   :  { %177 = vst [vmem:[%s498_s1 + $0x30] sm:$0xf] %v176_v41 }

// kernel: net_forward.5
= control target key start
LH: loop header
LB: loop body
LE: loop exit
PB: predicated region body
PF: predicated region fallthrough
CT: control target
= control target key end

     0   :  { %v1084_v0 = vmov 0.0   ;;  %vm1085_vm0 = vmmov 0   ;;  %vm210_vm1 = vcmask 261120   ;;  %vm715_vm2 = vcmask 519168   ;;  %s1516_s1 = inlined_call_operand.vmem [shape: bf16[32,64], index: 1, kind: input, shape index: {}]   ;;  %s1517_s0 = inlined_call_operand.vmem [shape: bf16[392,32], index: 0, kind: input, shape index: {}]   ;;  %s1518_s2 = inlined_call_operand.vmem [shape: f32[1,64], index: 2, kind: input, shape index: {}]   ;;  %s1519_s3 = inlined_call_operand.vmem [shape: bf16[392,64], index: 3, kind: output, shape index: {}]  }
   0x1   :  { %947 = vmatprep.subr.bf16.mxu0 %v1084_v0  ;;  %v1057_v1 = vld [vmem:[%s1516_s1] sm:$0xff]   ;;  %1051 = vmatprep.subr.bf16.mxu1 %v1084_v0  ;;  %v1058_v2 = vld [vmem:[%s1516_s1 + $0x8] sm:$0xff]   ;;  %v1062_v6 = vld [vmem:[%s1517_s0 + $0x70] sm:$0xff]  }
   0x2   :  { %951 = vmatprep.mubr.msk.bf16.mxu0 %vm1085_vm0, %v1084_v0  ;;  %1003 = vmatprep.mubr.msk.bf16.mxu1 %vm1085_vm0, %v1084_v0  ;;  %v1059_v3 = vld [vmem:[%s1517_s0] sm:$0xff]   ;;  %v1060_v4 = vld [vmem:[%s1517_s0 + $0x68] sm:$0xff]   ;;  %v1063_v7 = vld [vmem:[%s1517_s0 + $0x10] sm:$0xff]  }
   0x3   :  { %948 = vmatpush3.bf16.msra.mxu0 %v1057_v1  ;;  %1053 = vmatpush3.bf16.msra.mxu1 %v1057_v1  ;;  %v1061_v5 = vld [vmem:[%s1517_s0 + $0x8] sm:$0xff]   ;;  %v1064_v8 = vld [vmem:[%s1517_s0 + $0x78] sm:$0xff]   ;;  %v1066_v10 = vld [vmem:[%s1517_s0 + $0x80] sm:$0xff]  }
   0x4   :  { %949 = vmatprep.subr.bf16.mxu0 %v1084_v0  ;;  %1052 = vmatprep.subr.bf16.mxu1 %v1084_v0  ;;  %v1065_v9 = vld [vmem:[%s1517_s0 + $0x18] sm:$0xff]   ;;  %v1067_v11 = vld [vmem:[%s1517_s0 + $0x20] sm:$0xff]   ;;  %v1068_v12 = vld [vmem:[%s1517_s0 + $0x88] sm:$0xff]  }
   0x5   :  { %v1069_v13 = vld [vmem:[%s1517_s0 + $0x28] sm:$0xff]   ;;  %v1070_v14 = vld [vmem:[%s1517_s0 + $0x90] sm:$0xff]   ;;  %v1072_v16 = vld [vmem:[%s1517_s0 + $0x98] sm:$0xff]  }
   0x6   :  { %v1071_v15 = vld [vmem:[%s1517_s0 + $0x30] sm:$0xff]   ;;  %v1073_v17 = vld [vmem:[%s1517_s0 + $0x38] sm:$0xff]   ;;  %v1074_v18 = vld [vmem:[%s1517_s0 + $0xa0] sm:$0xff]  }
   0x7   :  { %950 = vmatpush3.bf16.msra.mxu0 %v1058_v2  ;;  %1054 = vmatpush3.bf16.msra.mxu1 %v1058_v2  ;;  %v1075_v19 = vld [vmem:[%s1517_s0 + $0x40] sm:$0xff]   ;;  %v1076_v20 = vld [vmem:[%s1517_s0 + $0xa8] sm:$0xff]   ;;  %v1078_v22 = vld [vmem:[%s1517_s0 + $0xb0] sm:$0xff]  }
   0x8   :  { %v1077_v21 = vld [vmem:[%s1517_s0 + $0x48] sm:$0xff]   ;;  %v1079_v23 = vld [vmem:[%s1517_s0 + $0x50] sm:$0xff]   ;;  %v1080_v24 = vld [vmem:[%s1517_s0 + $0xb8] sm:$0xff]  }
   0x9   :  { %v1081_v25 = vld [vmem:[%s1517_s0 + $0x58] sm:$0xff]   ;;  %v1082_v26 = vld [vmem:[%s1517_s0 + $0xc0] ss:$0 sps:$4 sm:$0xff]  }
   0xa   :  { %952 = vmatmul.mubr.msk.bf16.vlgmr.msra.gmra.mrb[0].mxu0 %vm210_vm1, %v1059_v3  ;;  %1004 = vmatmul.mubr.msk.bf16.vlgmr.msra.gmra.mrb[0].mxu1 %vm210_vm1, %v1060_v4  ;;  %v1083_v27 = vld [vmem:[%s1517_s0 + $0x60] sm:$0xff]  }
   0xb   :  { %955 = vmatprep.mubr.msk.bf16.mxu0 %vm1085_vm0, %v1084_v0  ;;  %1007 = vmatprep.mubr.msk.bf16.mxu1 %vm1085_vm0, %v1084_v0  ;;  %v1269_v28 = vld [vmem:[%s1518_s2] ss:$0 sm:$0xff] }
  0x12   :  { %956 = vmatmul.mubr.msk.bf16.gmra.mrb[4].mxu0 %vm210_vm1, %v1061_v5  ;;  %1008 = vmatmul.mubr.msk.bf16.gmra.mrb[4].mxu1 %vm210_vm1, %v1062_v6 }
  0x13   :  { %959 = vmatprep.mubr.msk.bf16.mxu0 %vm1085_vm0, %v1084_v0  ;;  %1011 = vmatprep.mubr.msk.bf16.mxu1 %vm1085_vm0, %v1084_v0 }
  0x1a   :  { %960 = vmatmul.mubr.msk.bf16.gmra.mrb[8].mxu0 %vm210_vm1, %v1063_v7  ;;  %1012 = vmatmul.mubr.msk.bf16.gmra.mrb[8].mxu1 %vm210_vm1, %v1064_v8 }
  0x1b   :  { %963 = vmatprep.mubr.msk.bf16.mxu0 %vm1085_vm0, %v1084_v0  ;;  %1015 = vmatprep.mubr.msk.bf16.mxu1 %vm1085_vm0, %v1084_v0 }
  0x22   :  { %964 = vmatmul.mubr.msk.bf16.gmra.mrb[12].mxu0 %vm210_vm1, %v1065_v9  ;;  %1016 = vmatmul.mubr.msk.bf16.gmra.mrb[12].mxu1 %vm210_vm1, %v1066_v10 }
  0x23   :  { %967 = vmatprep.mubr.msk.bf16.mxu0 %vm1085_vm0, %v1084_v0  ;;  %1019 = vmatprep.mubr.msk.bf16.mxu1 %vm1085_vm0, %v1084_v0 }
  0x2a   :  { %968 = vmatmul.mubr.msk.bf16.gmra.mrb[16].mxu0 %vm210_vm1, %v1067_v11  ;;  %1020 = vmatmul.mubr.msk.bf16.gmra.mrb[16].mxu1 %vm210_vm1, %v1068_v12 }
  0x2b   :  { %971 = vmatprep.mubr.msk.bf16.mxu0 %vm1085_vm0, %v1084_v0  ;;  %1023 = vmatprep.mubr.msk.bf16.mxu1 %vm1085_vm0, %v1084_v0 }
  0x32   :  { %972 = vmatmul.mubr.msk.bf16.gmra.mrb[20].mxu0 %vm210_vm1, %v1069_v13  ;;  %1024 = vmatmul.mubr.msk.bf16.gmra.mrb[20].mxu1 %vm210_vm1, %v1070_v14 }
  0x33   :  { %975 = vmatprep.mubr.msk.bf16.mxu0 %vm1085_vm0, %v1084_v0  ;;  %1027 = vmatprep.mubr.msk.bf16.mxu1 %vm1085_vm0, %v1084_v0 }
  0x3a   :  { %976 = vmatmul.mubr.msk.bf16.gmra.mrb[24].mxu0 %vm210_vm1, %v1071_v15  ;;  %1028 = vmatmul.mubr.msk.bf16.gmra.mrb[24].mxu1 %vm210_vm1, %v1072_v16 }
  0x3b   :  { %979 = vmatprep.mubr.msk.bf16.mxu0 %vm1085_vm0, %v1084_v0  ;;  %1031 = vmatprep.mubr.msk.bf16.mxu1 %vm1085_vm0, %v1084_v0 }
  0x42   :  { %980 = vmatmul.mubr.msk.bf16.gmra.mrb[28].mxu0 %vm210_vm1, %v1073_v17  ;;  %1032 = vmatmul.mubr.msk.bf16.gmra.mrb[28].mxu1 %vm210_vm1, %v1074_v18 }
  0x43   :  { %983 = vmatprep.mubr.msk.bf16.mxu0 %vm1085_vm0, %v1084_v0  ;;  %1035 = vmatprep.mubr.msk.bf16.mxu1 %vm1085_vm0, %v1084_v0 }
  0x4a   :  { %984 = vmatmul.mubr.msk.bf16.gmra.mrb[32].mxu0 %vm210_vm1, %v1075_v19  ;;  %1036 = vmatmul.mubr.msk.bf16.gmra.mrb[32].mxu1 %vm210_vm1, %v1076_v20 }
  0x4b   :  { %987 = vmatprep.mubr.msk.bf16.mxu0 %vm1085_vm0, %v1084_v0  ;;  %1039 = vmatprep.mubr.msk.bf16.mxu1 %vm1085_vm0, %v1084_v0 }
  0x52   :  { %988 = vmatmul.mubr.msk.bf16.gmra.mrb[36].mxu0 %vm210_vm1, %v1077_v21  ;;  %1040 = vmatmul.mubr.msk.bf16.gmra.mrb[36].mxu1 %vm210_vm1, %v1078_v22 }
  0x53   :  { %991 = vmatprep.mubr.msk.bf16.mxu0 %vm1085_vm0, %v1084_v0  ;;  %1043 = vmatprep.mubr.msk.bf16.mxu1 %vm1085_vm0, %v1084_v0 }
  0x5a   :  { %992 = vmatmul.mubr.msk.bf16.gmra.mrb[40].mxu0 %vm210_vm1, %v1079_v23  ;;  %1044 = vmatmul.mubr.msk.bf16.gmra.mrb[40].mxu1 %vm210_vm1, %v1080_v24 }
  0x5b   :  { %995 = vmatprep.mubr.msk.bf16.mxu0 %vm1085_vm0, %v1084_v0  ;;  %1047 = vmatprep.mubr.msk.bf16.mxu1 %vm1085_vm0, %v1084_v0 }
  0x62   :  { %996 = vmatmul.mubr.msk.bf16.gmra.mrb[44].mxu0 %vm210_vm1, %v1081_v25  ;;  %1048 = vmatmul.mubr.msk.bf16.gmra.mrb[44].mxu1 %vm210_vm1, %v1082_v26 }
  0x63   :  { %999 = vmatprep.mubr.msk.bf16.mxu0 %vm1085_vm0, %v1084_v0 }
  0x6a   :  { %1000 = vmatmul.mubr.msk.bf16.gmra.mrb[48].mxu0 %vm210_vm1, %v1083_v27 }
  0xdd   :  { %v320_v29 = vpop.f32.mrb[0].mxu0  ;;  %v424_v30 = vpop.f32.mrb[0].mxu1 }
  0xde   :  { %v321_v31 = vadd.f32 %v1269_v28, %v320_v29  ;;  %v953_v32 = vpop.f32.mrb[1].mxu0  ;;  %v425_v33 = vadd.f32 %v1269_v28, %v424_v30  ;;  %v1005_v34 = vpop.f32.mrb[1].mxu1 }
  0xdf   :  { %v323_v35 = vpop.f32.mrb[2].mxu0  ;;  %v427_v36 = vpop.f32.mrb[2].mxu1 }
  0xe0   :  { %v871_v37 = vpack.c.bf16 %v321_v31, %v321_v31  ;;  %v324_v38 = vadd.f32 %v1269_v28, %v323_v35  ;;  %v954_v39 = vpop.f32.mrb[3].mxu0  ;;  %v897_v40 = vpack.c.bf16 %v425_v33, %v425_v33  ;;  %v428_v41 = vadd.f32 %v1269_v28, %v427_v36  ;;  %v1006_v42 = vpop.f32.mrb[3].mxu1 }
  0xe2   :  { %716 = vst.msk [vmem:[%s1519_s3] sm:$0xf] %vm715_vm2, %v871_v37  ;;  %v872_v43 = vpack.c.bf16 %v324_v38, %v324_v38  ;;  %742 = vst.msk [vmem:[%s1519_s3 + $0x68] sm:$0xf] %vm715_vm2, %v897_v40  ;;  %v898_v44 = vpack.c.bf16 %v428_v41, %v428_v41 }
  0xe4   :  { %717 = vst.msk [vmem:[%s1519_s3 + $0x4] sm:$0xf] %vm715_vm2, %v872_v43  ;;  %743 = vst.msk [vmem:[%s1519_s3 + $0x6c] sm:$0xf] %vm715_vm2, %v898_v44 }
  0xe5   :  { %v328_v45 = vpop.f32.mrb[4].mxu0  ;;  %v432_v46 = vpop.f32.mrb[4].mxu1 }
  0xe6   :  { %v329_v47 = vadd.f32 %v1269_v28, %v328_v45  ;;  %v957_v48 = vpop.f32.mrb[5].mxu0  ;;  %v433_v49 = vadd.f32 %v1269_v28, %v432_v46  ;;  %v1009_v50 = vpop.f32.mrb[5].mxu1 }
  0xe7   :  { %v331_v51 = vpop.f32.mrb[6].mxu0  ;;  %v435_v52 = vpop.f32.mrb[6].mxu1 }
  0xe8   :  { %v873_v53 = vpack.c.bf16 %v329_v47, %v329_v47  ;;  %v332_v54 = vadd.f32 %v1269_v28, %v331_v51  ;;  %v958_v55 = vpop.f32.mrb[7].mxu0  ;;  %v899_v56 = vpack.c.bf16 %v433_v49, %v433_v49  ;;  %v436_v57 = vadd.f32 %v1269_v28, %v435_v52  ;;  %v1010_v58 = vpop.f32.mrb[7].mxu1 }
  0xea   :  { %718 = vst.msk [vmem:[%s1519_s3 + $0x8] sm:$0xf] %vm715_vm2, %v873_v53  ;;  %v874_v59 = vpack.c.bf16 %v332_v54, %v332_v54  ;;  %744 = vst.msk [vmem:[%s1519_s3 + $0x70] sm:$0xf] %vm715_vm2, %v899_v56  ;;  %v900_v60 = vpack.c.bf16 %v436_v57, %v436_v57 }
  0xec   :  { %719 = vst.msk [vmem:[%s1519_s3 + $0xc] sm:$0xf] %vm715_vm2, %v874_v59  ;;  %745 = vst.msk [vmem:[%s1519_s3 + $0x74] sm:$0xf] %vm715_vm2, %v900_v60 }
  0xed   :  { %v336_v61 = vpop.f32.mrb[8].mxu0  ;;  %v440_v62 = vpop.f32.mrb[8].mxu1 }
  0xee   :  { %v337_v63 = vadd.f32 %v1269_v28, %v336_v61  ;;  %v961_v0 = vpop.f32.mrb[9].mxu0  ;;  %v441_v1 = vadd.f32 %v1269_v28, %v440_v62  ;;  %v1013_v2 = vpop.f32.mrb[9].mxu1 }
  0xef   :  { %v339_v3 = vpop.f32.mrb[10].mxu0  ;;  %v443_v4 = vpop.f32.mrb[10].mxu1 }
  0xf0   :  { %v875_v5 = vpack.c.bf16 %v337_v63, %v337_v63  ;;  %v340_v6 = vadd.f32 %v1269_v28, %v339_v3  ;;  %v962_v7 = vpop.f32.mrb[11].mxu0  ;;  %v901_v8 = vpack.c.bf16 %v441_v1, %v441_v1  ;;  %v444_v9 = vadd.f32 %v1269_v28, %v443_v4  ;;  %v1014_v10 = vpop.f32.mrb[11].mxu1 }
  0xf2   :  { %720 = vst.msk [vmem:[%s1519_s3 + $0x10] sm:$0xf] %vm715_vm2, %v875_v5  ;;  %v876_v11 = vpack.c.bf16 %v340_v6, %v340_v6  ;;  %746 = vst.msk [vmem:[%s1519_s3 + $0x78] sm:$0xf] %vm715_vm2, %v901_v8  ;;  %v902_v12 = vpack.c.bf16 %v444_v9, %v444_v9 }
  0xf4   :  { %721 = vst.msk [vmem:[%s1519_s3 + $0x14] sm:$0xf] %vm715_vm2, %v876_v11  ;;  %747 = vst.msk [vmem:[%s1519_s3 + $0x7c] sm:$0xf] %vm715_vm2, %v902_v12 }
  0xf5   :  { %v344_v13 = vpop.f32.mrb[12].mxu0  ;;  %v448_v14 = vpop.f32.mrb[12].mxu1 }
  0xf6   :  { %v345_v15 = vadd.f32 %v1269_v28, %v344_v13  ;;  %v965_v16 = vpop.f32.mrb[13].mxu0  ;;  %v449_v17 = vadd.f32 %v1269_v28, %v448_v14  ;;  %v1017_v18 = vpop.f32.mrb[13].mxu1 }
  0xf7   :  { %v347_v19 = vpop.f32.mrb[14].mxu0  ;;  %v451_v20 = vpop.f32.mrb[14].mxu1 }
  0xf8   :  { %v877_v21 = vpack.c.bf16 %v345_v15, %v345_v15  ;;  %v348_v22 = vadd.f32 %v1269_v28, %v347_v19  ;;  %v966_v23 = vpop.f32.mrb[15].mxu0  ;;  %v903_v24 = vpack.c.bf16 %v449_v17, %v449_v17  ;;  %v452_v25 = vadd.f32 %v1269_v28, %v451_v20  ;;  %v1018_v26 = vpop.f32.mrb[15].mxu1 }
  0xfa   :  { %722 = vst.msk [vmem:[%s1519_s3 + $0x18] sm:$0xf] %vm715_vm2, %v877_v21  ;;  %v878_v27 = vpack.c.bf16 %v348_v22, %v348_v22  ;;  %748 = vst.msk [vmem:[%s1519_s3 + $0x80] sm:$0xf] %vm715_vm2, %v903_v24  ;;  %v904_v29 = vpack.c.bf16 %v452_v25, %v452_v25 }
  0xfc   :  { %723 = vst.msk [vmem:[%s1519_s3 + $0x1c] sm:$0xf] %vm715_vm2, %v878_v27  ;;  %749 = vst.msk [vmem:[%s1519_s3 + $0x84] sm:$0xf] %vm715_vm2, %v904_v29 }
  0xfd   :  { %v352_v30 = vpop.f32.mrb[16].mxu0  ;;  %v456_v31 = vpop.f32.mrb[16].mxu1 }
  0xfe   :  { %v353_v32 = vadd.f32 %v1269_v28, %v352_v30  ;;  %v969_v33 = vpop.f32.mrb[17].mxu0  ;;  %v457_v34 = vadd.f32 %v1269_v28, %v456_v31  ;;  %v1021_v35 = vpop.f32.mrb[17].mxu1 }
  0xff   :  { %v355_v36 = vpop.f32.mrb[18].mxu0  ;;  %v459_v37 = vpop.f32.mrb[18].mxu1 }
 0x100   :  { %v879_v38 = vpack.c.bf16 %v353_v32, %v353_v32  ;;  %v356_v39 = vadd.f32 %v1269_v28, %v355_v36  ;;  %v970_v40 = vpop.f32.mrb[19].mxu0  ;;  %v905_v41 = vpack.c.bf16 %v457_v34, %v457_v34  ;;  %v460_v42 = vadd.f32 %v1269_v28, %v459_v37  ;;  %v1022_v43 = vpop.f32.mrb[19].mxu1 }
 0x102   :  { %724 = vst.msk [vmem:[%s1519_s3 + $0x20] sm:$0xf] %vm715_vm2, %v879_v38  ;;  %v880_v44 = vpack.c.bf16 %v356_v39, %v356_v39  ;;  %750 = vst.msk [vmem:[%s1519_s3 + $0x88] sm:$0xf] %vm715_vm2, %v905_v41  ;;  %v906_v45 = vpack.c.bf16 %v460_v42, %v460_v42 }
 0x104   :  { %725 = vst.msk [vmem:[%s1519_s3 + $0x24] sm:$0xf] %vm715_vm2, %v880_v44  ;;  %751 = vst.msk [vmem:[%s1519_s3 + $0x8c] sm:$0xf] %vm715_vm2, %v906_v45 }
 0x105   :  { %v360_v46 = vpop.f32.mrb[20].mxu0  ;;  %v464_v47 = vpop.f32.mrb[20].mxu1 }
 0x106   :  { %v361_v48 = vadd.f32 %v1269_v28, %v360_v46  ;;  %v973_v49 = vpop.f32.mrb[21].mxu0  ;;  %v465_v50 = vadd.f32 %v1269_v28, %v464_v47  ;;  %v1025_v51 = vpop.f32.mrb[21].mxu1 }
 0x107   :  { %v363_v52 = vpop.f32.mrb[22].mxu0  ;;  %v467_v53 = vpop.f32.mrb[22].mxu1 }
 0x108   :  { %v881_v54 = vpack.c.bf16 %v361_v48, %v361_v48  ;;  %v364_v55 = vadd.f32 %v1269_v28, %v363_v52  ;;  %v974_v56 = vpop.f32.mrb[23].mxu0  ;;  %v907_v57 = vpack.c.bf16 %v465_v50, %v465_v50  ;;  %v468_v58 = vadd.f32 %v1269_v28, %v467_v53  ;;  %v1026_v59 = vpop.f32.mrb[23].mxu1 }
 0x10a   :  { %726 = vst.msk [vmem:[%s1519_s3 + $0x28] sm:$0xf] %vm715_vm2, %v881_v54  ;;  %v882_v60 = vpack.c.bf16 %v364_v55, %v364_v55  ;;  %752 = vst.msk [vmem:[%s1519_s3 + $0x90] sm:$0xf] %vm715_vm2, %v907_v57  ;;  %v908_v61 = vpack.c.bf16 %v468_v58, %v468_v58 }
 0x10c   :  { %727 = vst.msk [vmem:[%s1519_s3 + $0x2c] sm:$0xf] %vm715_vm2, %v882_v60  ;;  %753 = vst.msk [vmem:[%s1519_s3 + $0x94] sm:$0xf] %vm715_vm2, %v908_v61 }
 0x10d   :  { %v368_v62 = vpop.f32.mrb[24].mxu0  ;;  %v472_v63 = vpop.f32.mrb[24].mxu1 }
 0x10e   :  { %v369_v0 = vadd.f32 %v1269_v28, %v368_v62  ;;  %v977_v1 = vpop.f32.mrb[25].mxu0  ;;  %v473_v2 = vadd.f32 %v1269_v28, %v472_v63  ;;  %v1029_v3 = vpop.f32.mrb[25].mxu1 }
 0x10f   :  { %v371_v4 = vpop.f32.mrb[26].mxu0  ;;  %v475_v5 = vpop.f32.mrb[26].mxu1 }
 0x110   :  { %v883_v6 = vpack.c.bf16 %v369_v0, %v369_v0  ;;  %v372_v7 = vadd.f32 %v1269_v28, %v371_v4  ;;  %v978_v8 = vpop.f32.mrb[27].mxu0  ;;  %v909_v9 = vpack.c.bf16 %v473_v2, %v473_v2  ;;  %v476_v10 = vadd.f32 %v1269_v28, %v475_v5  ;;  %v1030_v11 = vpop.f32.mrb[27].mxu1 }
 0x112   :  { %728 = vst.msk [vmem:[%s1519_s3 + $0x30] sm:$0xf] %vm715_vm2, %v883_v6  ;;  %v884_v12 = vpack.c.bf16 %v372_v7, %v372_v7  ;;  %754 = vst.msk [vmem:[%s1519_s3 + $0x98] sm:$0xf] %vm715_vm2, %v909_v9  ;;  %v910_v13 = vpack.c.bf16 %v476_v10, %v476_v10 }
 0x114   :  { %729 = vst.msk [vmem:[%s1519_s3 + $0x34] sm:$0xf] %vm715_vm2, %v884_v12  ;;  %755 = vst.msk [vmem:[%s1519_s3 + $0x9c] sm:$0xf] %vm715_vm2, %v910_v13 }
 0x115   :  { %v376_v14 = vpop.f32.mrb[28].mxu0  ;;  %v480_v15 = vpop.f32.mrb[28].mxu1 }
 0x116   :  { %v377_v16 = vadd.f32 %v1269_v28, %v376_v14  ;;  %v981_v17 = vpop.f32.mrb[29].mxu0  ;;  %v481_v18 = vadd.f32 %v1269_v28, %v480_v15  ;;  %v1033_v19 = vpop.f32.mrb[29].mxu1 }
 0x117   :  { %v379_v20 = vpop.f32.mrb[30].mxu0  ;;  %v483_v21 = vpop.f32.mrb[30].mxu1 }
 0x118   :  { %v885_v22 = vpack.c.bf16 %v377_v16, %v377_v16  ;;  %v380_v23 = vadd.f32 %v1269_v28, %v379_v20  ;;  %v982_v24 = vpop.f32.mrb[31].mxu0  ;;  %v911_v25 = vpack.c.bf16 %v481_v18, %v481_v18  ;;  %v484_v26 = vadd.f32 %v1269_v28, %v483_v21  ;;  %v1034_v27 = vpop.f32.mrb[31].mxu1 }
 0x11a   :  { %730 = vst.msk [vmem:[%s1519_s3 + $0x38] sm:$0xf] %vm715_vm2, %v885_v22  ;;  %v886_v29 = vpack.c.bf16 %v380_v23, %v380_v23  ;;  %756 = vst.msk [vmem:[%s1519_s3 + $0xa0] sm:$0xf] %vm715_vm2, %v911_v25  ;;  %v912_v30 = vpack.c.bf16 %v484_v26, %v484_v26 }
 0x11c   :  { %731 = vst.msk [vmem:[%s1519_s3 + $0x3c] sm:$0xf] %vm715_vm2, %v886_v29  ;;  %757 = vst.msk [vmem:[%s1519_s3 + $0xa4] sm:$0xf] %vm715_vm2, %v912_v30 }
 0x11d   :  { %v384_v31 = vpop.f32.mrb[32].mxu0  ;;  %v488_v32 = vpop.f32.mrb[32].mxu1 }
 0x11e   :  { %v385_v33 = vadd.f32 %v1269_v28, %v384_v31  ;;  %v985_v34 = vpop.f32.mrb[33].mxu0  ;;  %v489_v35 = vadd.f32 %v1269_v28, %v488_v32  ;;  %v1037_v36 = vpop.f32.mrb[33].mxu1 }
 0x11f   :  { %v387_v37 = vpop.f32.mrb[34].mxu0  ;;  %v491_v38 = vpop.f32.mrb[34].mxu1 }
 0x120   :  { %v887_v39 = vpack.c.bf16 %v385_v33, %v385_v33  ;;  %v388_v40 = vadd.f32 %v1269_v28, %v387_v37  ;;  %v986_v41 = vpop.f32.mrb[35].mxu0  ;;  %v913_v42 = vpack.c.bf16 %v489_v35, %v489_v35  ;;  %v492_v43 = vadd.f32 %v1269_v28, %v491_v38  ;;  %v1038_v44 = vpop.f32.mrb[35].mxu1 }
 0x122   :  { %732 = vst.msk [vmem:[%s1519_s3 + $0x40] sm:$0xf] %vm715_vm2, %v887_v39  ;;  %v888_v45 = vpack.c.bf16 %v388_v40, %v388_v40  ;;  %758 = vst.msk [vmem:[%s1519_s3 + $0xa8] sm:$0xf] %vm715_vm2, %v913_v42  ;;  %v914_v46 = vpack.c.bf16 %v492_v43, %v492_v43 }
 0x124   :  { %733 = vst.msk [vmem:[%s1519_s3 + $0x44] sm:$0xf] %vm715_vm2, %v888_v45  ;;  %759 = vst.msk [vmem:[%s1519_s3 + $0xac] sm:$0xf] %vm715_vm2, %v914_v46 }
 0x125   :  { %v392_v47 = vpop.f32.mrb[36].mxu0  ;;  %v496_v48 = vpop.f32.mrb[36].mxu1 }
 0x126   :  { %v393_v49 = vadd.f32 %v1269_v28, %v392_v47  ;;  %v989_v50 = vpop.f32.mrb[37].mxu0  ;;  %v497_v51 = vadd.f32 %v1269_v28, %v496_v48  ;;  %v1041_v52 = vpop.f32.mrb[37].mxu1 }
 0x127   :  { %v395_v53 = vpop.f32.mrb[38].mxu0  ;;  %v499_v54 = vpop.f32.mrb[38].mxu1 }
 0x128   :  { %v889_v55 = vpack.c.bf16 %v393_v49, %v393_v49  ;;  %v396_v56 = vadd.f32 %v1269_v28, %v395_v53  ;;  %v990_v57 = vpop.f32.mrb[39].mxu0  ;;  %v915_v58 = vpack.c.bf16 %v497_v51, %v497_v51  ;;  %v500_v59 = vadd.f32 %v1269_v28, %v499_v54  ;;  %v1042_v60 = vpop.f32.mrb[39].mxu1 }
 0x12a   :  { %734 = vst.msk [vmem:[%s1519_s3 + $0x48] sm:$0xf] %vm715_vm2, %v889_v55  ;;  %v890_v61 = vpack.c.bf16 %v396_v56, %v396_v56  ;;  %760 = vst.msk [vmem:[%s1519_s3 + $0xb0] sm:$0xf] %vm715_vm2, %v915_v58  ;;  %v916_v62 = vpack.c.bf16 %v500_v59, %v500_v59 }
 0x12c   :  { %735 = vst.msk [vmem:[%s1519_s3 + $0x4c] sm:$0xf] %vm715_vm2, %v890_v61  ;;  %761 = vst.msk [vmem:[%s1519_s3 + $0xb4] sm:$0xf] %vm715_vm2, %v916_v62 }
 0x12d   :  { %v400_v63 = vpop.f32.mrb[40].mxu0  ;;  %v504_v0 = vpop.f32.mrb[40].mxu1 }
 0x12e   :  { %v401_v1 = vadd.f32 %v1269_v28, %v400_v63  ;;  %v993_v2 = vpop.f32.mrb[41].mxu0  ;;  %v505_v3 = vadd.f32 %v1269_v28, %v504_v0  ;;  %v1045_v4 = vpop.f32.mrb[41].mxu1 }
 0x12f   :  { %v403_v5 = vpop.f32.mrb[42].mxu0  ;;  %v507_v6 = vpop.f32.mrb[42].mxu1 }
 0x130   :  { %v891_v7 = vpack.c.bf16 %v401_v1, %v401_v1  ;;  %v404_v8 = vadd.f32 %v1269_v28, %v403_v5  ;;  %v994_v9 = vpop.f32.mrb[43].mxu0  ;;  %v917_v10 = vpack.c.bf16 %v505_v3, %v505_v3  ;;  %v508_v11 = vadd.f32 %v1269_v28, %v507_v6  ;;  %v1046_v12 = vpop.f32.mrb[43].mxu1 }
 0x132   :  { %736 = vst.msk [vmem:[%s1519_s3 + $0x50] sm:$0xf] %vm715_vm2, %v891_v7  ;;  %v892_v13 = vpack.c.bf16 %v404_v8, %v404_v8  ;;  %762 = vst.msk [vmem:[%s1519_s3 + $0xb8] sm:$0xf] %vm715_vm2, %v917_v10  ;;  %v918_v14 = vpack.c.bf16 %v508_v11, %v508_v11 }
 0x134   :  { %737 = vst.msk [vmem:[%s1519_s3 + $0x54] sm:$0xf] %vm715_vm2, %v892_v13  ;;  %763 = vst.msk [vmem:[%s1519_s3 + $0xbc] sm:$0xf] %vm715_vm2, %v918_v14 }
 0x135   :  { %v408_v15 = vpop.f32.mrb[44].mxu0  ;;  %v512_v16 = vpop.f32.mrb[44].mxu1 }
 0x136   :  { %v409_v17 = vadd.f32 %v1269_v28, %v408_v15  ;;  %v997_v18 = vpop.f32.mrb[45].mxu0  ;;  %v513_v19 = vadd.f32 %v1269_v28, %v512_v16  ;;  %v1049_v20 = vpop.f32.mrb[45].mxu1 }
 0x137   :  { %v411_v21 = vpop.f32.mrb[46].mxu0  ;;  %v515_v22 = vpop.f32.mrb[46].mxu1 }
 0x138   :  { %v893_v23 = vpack.c.bf16 %v409_v17, %v409_v17  ;;  %v412_v24 = vadd.f32 %v1269_v28, %v411_v21  ;;  %v998_v25 = vpop.f32.mrb[47].mxu0  ;;  %v919_v26 = vpack.c.bf16 %v513_v19, %v513_v19  ;;  %v1050_v27 = vpop.f32.mrb[47].mxu1 }
 0x13a   :  { %738 = vst.msk [vmem:[%s1519_s3 + $0x58] sm:$0xf] %vm715_vm2, %v893_v23  ;;  %v894_v29 = vpack.c.bf16 %v412_v24, %v412_v24  ;;  %764 = vst.msk [vmem:[%s1519_s3 + $0xc0] sm:$0xf] %vm715_vm2, %v919_v26 }
 0x13c   :  { %739 = vst.msk [vmem:[%s1519_s3 + $0x5c] sm:$0xf] %vm715_vm2, %v894_v29 }
 0x13d   :  { %v416_v30 = vpop.f32.mrb[48].mxu0 }
 0x13e   :  { %v417_v31 = vadd.f32 %v1269_v28, %v416_v30  ;;  %v1001_v32 = vpop.f32.mrb[49].mxu0 }
 0x13f   :  { %v419_v33 = vpop.f32.mrb[50].mxu0 }
 0x140   :  { %v895_v34 = vpack.c.bf16 %v417_v31, %v417_v31  ;;  %v420_v35 = vadd.f32 %v1269_v28, %v419_v33  ;;  %v1002_v36 = vpop.f32.mrb[51].mxu0 }
 0x142   :  { %740 = vst.msk [vmem:[%s1519_s3 + $0x60] sm:$0xf] %vm715_vm2, %v895_v34  ;;  %v896_v37 = vpack.c.bf16 %v420_v35, %v420_v35 }
 0x144   :  { %741 = vst.msk [vmem:[%s1519_s3 + $0x64] sm:$0xf] %vm715_vm2, %v896_v37 }

// kernel: net_forward.8
= control target key start
LH: loop header
LB: loop body
LE: loop exit
PB: predicated region body
PF: predicated region fallthrough
CT: control target
= control target key end

     0   :  { %v55_v19 = vmov 0   ;;  %s102_s0 = inlined_call_operand.vmem [shape: bf16[4,2,2,256], index: 0, kind: input, shape index: {}]   ;;  %s103_s1 = inlined_call_operand.vmem [shape: bf16[4,2,128], index: 1, kind: output, shape index: {}]  }
   0x1   :  { %v9_v0 = vld [vmem:[%s102_s0] sm:$0x3]  ;;  %v50_v1 = vld [vmem:[%s102_s0 + $0x2] sm:$0x3]  ;;  %v10_v2 = vld [vmem:[%s102_s0 + $0x4] sm:$0x3] }
   0x2   :  { %v18_v3 = vmax.bf16 %v50_v1, %v9_v0  ;;  %v51_v4 = vld [vmem:[%s102_s0 + $0x6] sm:$0x3]  ;;  %v11_v5 = vld [vmem:[%s102_s0 + $0x8] sm:$0x3]  ;;  %v52_v6 = vld [vmem:[%s102_s0 + $0xa] sm:$0x3] }
   0x3   :  { %v19_v7 = vmax.bf16 %v51_v4, %v10_v2  ;;  %v20_v8 = vmax.bf16 %v52_v6, %v11_v5  ;;  %v12_v9 = vld [vmem:[%s102_s0 + $0xc] sm:$0x3]  ;;  %v53_v10 = vld [vmem:[%s102_s0 + $0xe] sm:$0x3] }
   0x4   :  { %v26_v11 = vrot.slane %v18_v3, 1  ;;  %v21_v12 = vmax.bf16 %v53_v10, %v12_v9 }
   0x5   :  { %v27_v13 = vrot.slane %v19_v7, 1  ;;  %v28_v14 = vrot.slane %v20_v8, 1 }
   0x6   :  { %v34_v15 = vmax.bf16 %v26_v11, %v18_v3  ;;  %v29_v16 = vrot.slane %v21_v12, 1 }
   0x7   :  { %v35_v17 = vmax.bf16 %v27_v13, %v19_v7  ;;  %v36_v18 = vmax.bf16 %v28_v14, %v20_v8 }
   0x8   :  { %v38_v20 = vmax.bf16 %v55_v19, %v34_v15  ;;  %v37_v21 = vmax.bf16 %v29_v16, %v21_v12 }
   0x9   :  { %v39_v22 = vmax.bf16 %v55_v19, %v35_v17  ;;  %v40_v23 = vmax.bf16 %v55_v19, %v36_v18 }
   0xa   :  { %42 = vst [vmem:[%s103_s1] sm:$0x1] %v38_v20  ;;  %v41_v24 = vmax.bf16 %v55_v19, %v37_v21 }
   0xb   :  { %43 = vst [vmem:[%s103_s1 + $0x1] sm:$0x1] %v39_v22  ;;  %44 = vst [vmem:[%s103_s1 + $0x2] sm:$0x1] %v40_v23 }
   0xc   :  { %45 = vst [vmem:[%s103_s1 + $0x3] sm:$0x1] %v41_v24 }

// kernel: net_forward.7
= control target key start
LH: loop header
LB: loop body
LE: loop exit
PB: predicated region body
PF: predicated region fallthrough
CT: control target
= control target key end

     0   :  { %vm980_vm0 = vcmask 523264   ;;  %s2233_s1 = inlined_call_operand.vmem [shape: bf16[1600,128], index: 1, kind: input, shape index: {}]   ;;  %s2234_s0 = inlined_call_operand.vmem [shape: bf16[32,1600], index: 0, kind: input, shape index: {}]   ;;  %s2235_s2 = inlined_call_operand.vmem [shape: f32[1,128], index: 2, kind: input, shape index: {}]   ;;  %s2236_s3 = inlined_call_operand.vmem [shape: bf16[32,128], index: 3, kind: output, shape index: {}]  }
   0x1   :  { %v1688_v0 = vld [vmem:[%s2233_s1 + $0x40] sm:$0xff]   ;;  %v1692_v4 = vld [vmem:[%s2233_s1 + $0x48] sm:$0xff]   ;;  %v1696_v8 = vld [vmem:[%s2233_s1 + $0x50] sm:$0xff]  }
   0x2   :  { %v1689_v1 = vld [vmem:[%s2233_s1] sm:$0xff]   ;;  %1502 = vmatprep.subr.bf16.mxu0 %v1688_v0  ;;  %v1693_v5 = vld [vmem:[%s2233_s1 + $0x8] sm:$0xff]   ;;  %v1697_v9 = vld [vmem:[%s2233_s1 + $0x10] sm:$0xff]  }
   0x3   :  { %v1690_v2 = vld [vmem:[%s2233_s1 + $0xc0] sm:$0xff]   ;;  %1503 = vmatpush3.bf16.msra.mxu0 %v1689_v1  ;;  %v1694_v6 = vld [vmem:[%s2233_s1 + $0xc8] sm:$0xff]   ;;  %v1698_v10 = vld [vmem:[%s2233_s1 + $0xd0] sm:$0xff]  }
   0x4   :  { %v1691_v3 = vld [vmem:[%s2233_s1 + $0x80] sm:$0xff]   ;;  %1530 = vmatprep.subr.bf16.mxu1 %v1690_v2  ;;  %1504 = vmatprep.subr.bf16.mxu0 %v1692_v4  ;;  %v1695_v7 = vld [vmem:[%s2233_s1 + $0x88] sm:$0xff]   ;;  %v1699_v11 = vld [vmem:[%s2233_s1 + $0x90] sm:$0xff]  }
   0x5   :  { %1531 = vmatpush3.bf16.msra.mxu1 %v1691_v3  ;;  %v1700_v12 = vld [vmem:[%s2233_s1 + $0x58] sm:$0xff]   ;;  %v1704_v16 = vld [vmem:[%s2233_s1 + $0x60] sm:$0xff]   ;;  %v1708_v20 = vld [vmem:[%s2233_s1 + $0x68] sm:$0xff]  }
   0x6   :  { %1532 = vmatprep.subr.bf16.mxu1 %v1694_v6  ;;  %v1701_v13 = vld [vmem:[%s2233_s1 + $0x18] sm:$0xff]   ;;  %v1705_v17 = vld [vmem:[%s2233_s1 + $0x20] sm:$0xff]   ;;  %v1709_v21 = vld [vmem:[%s2233_s1 + $0x28] sm:$0xff]  }
   0x7   :  { %1505 = vmatpush3.bf16.msra.mxu0 %v1693_v5  ;;  %v1702_v14 = vld [vmem:[%s2233_s1 + $0xd8] sm:$0xff]   ;;  %v1706_v18 = vld [vmem:[%s2233_s1 + $0xe0] sm:$0xff]   ;;  %v1710_v22 = vld [vmem:[%s2233_s1 + $0xe8] sm:$0xff]  }
   0x8   :  { %1506 = vmatprep.subr.bf16.mxu0 %v1696_v8  ;;  %v1703_v15 = vld [vmem:[%s2233_s1 + $0x98] sm:$0xff]   ;;  %v1707_v19 = vld [vmem:[%s2233_s1 + $0xa0] sm:$0xff]   ;;  %v1711_v23 = vld [vmem:[%s2233_s1 + $0xa8] sm:$0xff]  }
   0x9   :  { %1533 = vmatpush3.bf16.msra.mxu1 %v1695_v7  ;;  %v1712_v24 = vld [vmem:[%s2233_s1 + $0x70] sm:$0xff]   ;;  %v1716_v28 = vld [vmem:[%s2233_s1 + $0x78] sm:$0xff]   ;;  %v1723_v34 = vld [vmem:[%s2233_s1 + $0x140] sm:$0xff]  }
   0xa   :  { %1534 = vmatprep.subr.bf16.mxu1 %v1698_v10  ;;  %v1713_v25 = vld [vmem:[%s2233_s1 + $0x30] sm:$0xff]   ;;  %v1717_v29 = vld [vmem:[%s2233_s1 + $0x38] sm:$0xff]   ;;  %v1726_v36 = vld [vmem:[%s2234_s0 + $0xc] ss:$52 sps:$4 sm:$0xff]  }
   0xb   :  { %1507 = vmatpush3.bf16.msra.mxu0 %v1697_v9  ;;  %v1714_v26 = vld [vmem:[%s2233_s1 + $0xf0] sm:$0xff]   ;;  %v1718_v30 = vld [vmem:[%s2233_s1 + $0xf8] sm:$0xff]   ;;  %v1727_v37 = vld [vmem:[%s2233_s1 + $0x100] sm:$0xff]   ;;  %1068 = vmatprep.mubr.bf16.mxu1 %v1726_v36 }
   0xc   :  { %1508 = vmatprep.subr.bf16.mxu0 %v1700_v12  ;;  %v1715_v27 = vld [vmem:[%s2233_s1 + $0xb0] sm:$0xff]   ;;  %v1721_v32 = vld [vmem:[%s2234_s0 + $0x4] ss:$52 sps:$4 sm:$0xff]   ;;  %v1724_v35 = vld [vmem:[%s2234_s0 + $0x8] ss:$52 sps:$4 sm:$0xff]  }
   0xd   :  { %1535 = vmatpush3.bf16.msra.mxu1 %v1699_v11  ;;  %v1719_v31 = vld [vmem:[%s2234_s0] ss:$52 sps:$4 sm:$0xff]   ;;  %v1722_v33 = vld [vmem:[%s2233_s1 + $0xb8] sm:$0xff]   ;;  %1019 = vmatprep.mubr.bf16.mxu0 %v1721_v32  ;;  %v1730_v40 = vld [vmem:[%s2233_s1 + $0x148] sm:$0xff]  }
   0xe   :  { %1536 = vmatprep.subr.bf16.mxu1 %v1702_v14  ;;  %v1728_v38 = vld [vmem:[%s2233_s1 + $0x1c0] sm:$0xff]   ;;  %v1731_v41 = vld [vmem:[%s2233_s1 + $0x108] sm:$0xff]   ;;  %v1734_v44 = vld [vmem:[%s2233_s1 + $0x150] sm:$0xff]  }
   0xf   :  { %1509 = vmatpush3.bf16.msra.mxu0 %v1701_v13  ;;  %v1729_v39 = vld [vmem:[%s2233_s1 + $0x180] sm:$0xff]   ;;  %v1732_v42 = vld [vmem:[%s2233_s1 + $0x1c8] sm:$0xff]   ;;  %v1735_v45 = vld [vmem:[%s2233_s1 + $0x110] sm:$0xff]  }
  0x10   :  { %1510 = vmatprep.subr.bf16.mxu0 %v1704_v16  ;;  %v1733_v43 = vld [vmem:[%s2233_s1 + $0x188] sm:$0xff]   ;;  %v1736_v46 = vld [vmem:[%s2233_s1 + $0x1d0] sm:$0xff]   ;;  %v1738_v48 = vld [vmem:[%s2233_s1 + $0x158] sm:$0xff]  }
  0x11   :  { %1537 = vmatpush3.bf16.msra.mxu1 %v1703_v15  ;;  %v1737_v47 = vld [vmem:[%s2233_s1 + $0x190] sm:$0xff]   ;;  %v1739_v49 = vld [vmem:[%s2233_s1 + $0x118] sm:$0xff]   ;;  %v1742_v52 = vld [vmem:[%s2233_s1 + $0x160] sm:$0xff]  }
  0x12   :  { %1538 = vmatprep.subr.bf16.mxu1 %v1706_v18  ;;  %v1740_v50 = vld [vmem:[%s2233_s1 + $0x1d8] sm:$0xff]   ;;  %v1743_v53 = vld [vmem:[%s2233_s1 + $0x120] sm:$0xff]   ;;  %v1746_v56 = vld [vmem:[%s2233_s1 + $0x168] sm:$0xff]  }
  0x13   :  { %1511 = vmatpush3.bf16.msra.mxu0 %v1705_v17  ;;  %v1741_v51 = vld [vmem:[%s2233_s1 + $0x198] sm:$0xff]   ;;  %v1744_v54 = vld [vmem:[%s2233_s1 + $0x1e0] sm:$0xff]   ;;  %v1749_v58 = vld [vmem:[%s2233_s1 + $0x128] sm:$0xff]  }
  0x14   :  { %1512 = vmatprep.subr.bf16.mxu0 %v1708_v20  ;;  %v1745_v55 = vld [vmem:[%s2233_s1 + $0x1a0] sm:$0xff]   ;;  %v1750_v59 = vld [vmem:[%s2234_s0 + $0x68] ss:$52 sps:$4 sm:$0xff]   ;;  %v1756_v0 = vld [vmem:[%s2233_s1 + $0x170] sm:$0xff]  }
  0x15   :  { %1539 = vmatpush3.bf16.msra.mxu1 %v1707_v19  ;;  %v1747_v57 = vld [vmem:[%s2234_s0 + $0x6c] ss:$52 sps:$4 sm:$0xff]   ;;  %v1752_v61 = vld [vmem:[%s2234_s0 + $0x74] ss:$52 sps:$4 sm:$0xff]   ;;  %v1755_v63 = vld [vmem:[%s2234_s0 + $0x70] ss:$52 sps:$4 sm:$0xff]  }
  0x16   :  { %1540 = vmatprep.subr.bf16.mxu1 %v1710_v22  ;;  %v1751_v60 = vld [vmem:[%s2233_s1 + $0x1e8] sm:$0xff]   ;;  %v1757_v1 = vld [vmem:[%s2233_s1 + $0x130] sm:$0xff]   ;;  %v1760_v4 = vld [vmem:[%s2233_s1 + $0x178] sm:$0xff]  }
  0x17   :  { %1513 = vmatpush3.bf16.msra.mxu0 %v1709_v21  ;;  %v1754_v62 = vld [vmem:[%s2233_s1 + $0x1a8] sm:$0xff]   ;;  %v1758_v2 = vld [vmem:[%s2233_s1 + $0x1f0] sm:$0xff]   ;;  %v1761_v5 = vld [vmem:[%s2233_s1 + $0x138] sm:$0xff]  }
  0x18   :  { %1514 = vmatprep.subr.bf16.mxu0 %v1712_v24  ;;  %v1759_v3 = vld [vmem:[%s2233_s1 + $0x1b0] sm:$0xff]   ;;  %v1762_v6 = vld [vmem:[%s2233_s1 + $0x1f8] sm:$0xff]   ;;  %v1767_v10 = vld [vmem:[%s2233_s1 + $0x240] sm:$0xff]  }
  0x19   :  { %1541 = vmatpush3.bf16.msra.mxu1 %v1711_v23  ;;  %v1763_v7 = vld [vmem:[%s2234_s0 + $0x10] ss:$52 sps:$4 sm:$0xff]   ;;  %v1765_v8 = vld [vmem:[%s2234_s0 + $0x14] ss:$52 sps:$4 sm:$0xff]   ;;  %v1766_v9 = vld [vmem:[%s2233_s1 + $0x1b8] sm:$0xff]  }
  0x1a   :  { %1542 = vmatprep.subr.bf16.mxu1 %v1714_v26  ;;  %v1768_v11 = vld [vmem:[%s2234_s0 + $0x18] ss:$52 sps:$4 sm:$0xff]   ;;  %v1770_v12 = vld [vmem:[%s2234_s0 + $0x1c] ss:$52 sps:$4 sm:$0xff]   ;;  %v1771_v13 = vld [vmem:[%s2233_s1 + $0x200] sm:$0xff]  }
  0x1b   :  { %1515 = vmatpush3.bf16.msra.mxu0 %v1713_v25  ;;  %v1772_v14 = vld [vmem:[%s2233_s1 + $0x2c0] sm:$0xff]   ;;  %v1774_v16 = vld [vmem:[%s2233_s1 + $0x248] sm:$0xff]   ;;  %v1777_v19 = vld [vmem:[%s2234_s0 + $0x7c] ss:$52 sps:$4 sm:$0xff]  }
  0x1c   :  { %1516 = vmatprep.subr.bf16.mxu0 %v1716_v28  ;;  %v1773_v15 = vld [vmem:[%s2233_s1 + $0x280] sm:$0xff]   ;;  %v1775_v17 = vld [vmem:[%s2233_s1 + $0x208] sm:$0xff]   ;;  %v1781_v22 = vld [vmem:[%s2233_s1 + $0x250] sm:$0xff]  }
  0x1d   :  { %1543 = vmatpush3.bf16.msra.mxu1 %v1715_v27  ;;  %v1776_v18 = vld [vmem:[%s2233_s1 + $0x2c8] sm:$0xff]   ;;  %v1782_v23 = vld [vmem:[%s2234_s0 + $0x84] ss:$52 sps:$4 sm:$0xff]   ;;  %v1784_v24 = vld [vmem:[%s2233_s1 + $0x210] sm:$0xff]  }
  0x1e   :  { %1544 = vmatprep.subr.bf16.mxu1 %v1718_v30  ;;  %v1779_v20 = vld [vmem:[%s2233_s1 + $0x288] sm:$0xff]   ;;  %v1785_v25 = vld [vmem:[%s2234_s0 + $0x80] ss:$52 sps:$4 sm:$0xff]   ;;  %v1788_v28 = vld [vmem:[%s2233_s1 + $0x258] sm:$0xff]  }
  0x1f   :  { %1517 = vmatpush3.bf16.msra.mxu0 %v1717_v29  ;;  %v1780_v21 = vld [vmem:[%s2234_s0 + $0x78] ss:$52 sps:$4 sm:$0xff]   ;;  %v1786_v26 = vld [vmem:[%s2233_s1 + $0x2d0] sm:$0xff]   ;;  %v1792_v32 = vld [vmem:[%s2233_s1 + $0x260] sm:$0xff]  }
  0x20   :  { %1558 = vmatprep.subr.bf16.mxu0 %v1723_v34  ;;  %v1787_v27 = vld [vmem:[%s2233_s1 + $0x290] sm:$0xff]   ;;  %v1789_v29 = vld [vmem:[%s2233_s1 + $0x218] sm:$0xff]   ;;  %v1794_v34 = vld [vmem:[%s2233_s1 + $0x2e0] sm:$0xff]  }
  0x21   :  { %1545 = vmatpush3.bf16.msra.mxu1 %v1722_v33  ;;  %v1790_v30 = vld [vmem:[%s2233_s1 + $0x2d8] sm:$0xff]   ;;  %v1793_v33 = vld [vmem:[%s2233_s1 + $0x220] sm:$0xff]   ;;  %v1796_v36 = vld [vmem:[%s2233_s1 + $0x268] sm:$0xff]  }
  0x22   :  { %1020 = vmatmul.mubr.bf16.vlgmr.msra.gmra.mrb[0].mxu0 %v1719_v31  ;;  %1586 = vmatprep.subr.bf16.mxu1 %v1728_v38  ;;  %v1791_v31 = vld [vmem:[%s2233_s1 + $0x298] sm:$0xff]   ;;  %v1798_v38 = vld [vmem:[%s2233_s1 + $0x2e8] sm:$0xff]  }
  0x23   :  { %1559 = vmatpush3.bf16.msra.mxu0 %v1727_v37  ;;  %1027 = vmatprep.mubr.bf16.mxu0 %v1747_v57  ;;  %v1797_v37 = vld [vmem:[%s2233_s1 + $0x228] sm:$0xff]  }
  0x24   :  { %1069 = vmatmul.mubr.bf16.vlgmr.msra.gmra.mrb[0].mxu1 %v1724_v35  ;;  %1560 = vmatprep.subr.bf16.mxu0 %v1730_v40  ;;  %v1795_v35 = vld [vmem:[%s2233_s1 + $0x2a0] sm:$0xff]   ;;  %v1800_v40 = vld [vmem:[%s2233_s1 + $0x270] sm:$0xff]  }
  0x25   :  { %1587 = vmatpush3.bf16.msra.mxu1 %v1729_v39  ;;  %1076 = vmatprep.mubr.bf16.mxu1 %v1752_v61  ;;  %v1799_v39 = vld [vmem:[%s2233_s1 + $0x2a8] sm:$0xff]  }
  0x26   :  { %1588 = vmatprep.subr.bf16.mxu1 %v1732_v42  ;;  %v1802_v42 = vld [vmem:[%s2233_s1 + $0x2f0] sm:$0xff]   ;;  %v1825_v61 = vld [vmem:[%s2234_s0 + $0x98] ss:$52 sps:$4 sm:$0xff]  }
  0x27   :  { %1561 = vmatpush3.bf16.msra.mxu0 %v1731_v41  ;;  %v1801_v41 = vld [vmem:[%s2233_s1 + $0x230] sm:$0xff]  }
  0x28   :  { %1562 = vmatprep.subr.bf16.mxu0 %v1734_v44  ;;  %v1804_v44 = vld [vmem:[%s2233_s1 + $0x278] sm:$0xff]   ;;  %v1820_v57 = vld [vmem:[%s2234_s0 + $0x94] ss:$52 sps:$4 sm:$0xff]  }
  0x29   :  { %1589 = vmatpush3.bf16.msra.mxu1 %v1733_v43  ;;  %v1803_v43 = vld [vmem:[%s2233_s1 + $0x2b0] sm:$0xff]  }
  0x2a   :  { %1590 = vmatprep.subr.bf16.mxu1 %v1736_v46  ;;  %1028 = vmatmul.mubr.bf16.gmra.mrb[4].mxu0 %v1750_v59  ;;  %v1806_v46 = vld [vmem:[%s2233_s1 + $0x2f8] sm:$0xff]   ;;  %v1824_v59 = vld [vmem:[%s2234_s0 + $0x30] ss:$52 sps:$4 sm:$0xff]  }
  0x2b   :  { %1563 = vmatpush3.bf16.msra.mxu0 %v1735_v45  ;;  %1117 = vmatprep.mubr.bf16.mxu0 %v1765_v8  ;;  %v1805_v45 = vld [vmem:[%s2233_s1 + $0x238] sm:$0xff]  }
  0x2c   :  { %1564 = vmatprep.subr.bf16.mxu0 %v1738_v48  ;;  %1077 = vmatmul.mubr.bf16.gmra.mrb[4].mxu1 %v1755_v63  ;;  %v1809_v48 = vld [vmem:[%s2234_s0 + $0x24] ss:$52 sps:$4 sm:$0xff]   ;;  %v1354_v63 = vld [vmem:[%s2235_s2] ss:$0 sm:$0xff] }
  0x2d   :  { %1591 = vmatpush3.bf16.msra.mxu1 %v1737_v47  ;;  %1166 = vmatprep.mubr.bf16.mxu1 %v1770_v12  ;;  %v1807_v47 = vld [vmem:[%s2234_s0 + $0x20] ss:$52 sps:$4 sm:$0xff]  }
  0x2e   :  { %1592 = vmatprep.subr.bf16.mxu1 %v1740_v50  ;;  %v1811_v50 = vld [vmem:[%s2233_s1 + $0x300] sm:$0xff]  }
  0x2f   :  { %1565 = vmatpush3.bf16.msra.mxu0 %v1739_v49  ;;  %v1810_v49 = vld [vmem:[%s2233_s1 + $0x2b8] sm:$0xff]  }
  0x30   :  { %1566 = vmatprep.subr.bf16.mxu0 %v1742_v52  ;;  %v1814_v52 = vld [vmem:[%s2234_s0 + $0x2c] ss:$52 sps:$4 sm:$0xff]  }
  0x31   :  { %1593 = vmatpush3.bf16.msra.mxu1 %v1741_v51  ;;  %v1812_v51 = vld [vmem:[%s2234_s0 + $0x28] ss:$52 sps:$4 sm:$0xff]  }
  0x32   :  { %1594 = vmatprep.subr.bf16.mxu1 %v1744_v54  ;;  %v1816_v54 = vld [vmem:[%s2234_s0 + $0x8c] ss:$52 sps:$4 sm:$0xff]  }
  0x33   :  { %1567 = vmatpush3.bf16.msra.mxu0 %v1743_v53  ;;  %v1815_v53 = vld [vmem:[%s2233_s1 + $0x308] sm:$0xff]  }
  0x34   :  { %1568 = vmatprep.subr.bf16.mxu0 %v1746_v56  ;;  %v1819_v56 = vld [vmem:[%s2233_s1 + $0x310] sm:$0xff]  }
  0x35   :  { %1595 = vmatpush3.bf16.msra.mxu1 %v1745_v55  ;;  %v1818_v55 = vld [vmem:[%s2234_s0 + $0x88] ss:$52 sps:$4 sm:$0xff]  }
  0x36   :  { %1596 = vmatprep.subr.bf16.mxu1 %v1751_v60  ;;  %v1822_v60 = vld [vmem:[%s2234_s0 + $0x90] ss:$52 sps:$4 sm:$0xff]  }
  0x37   :  { %1569 = vmatpush3.bf16.msra.mxu0 %v1749_v58  ;;  %v1823_v58 = vld [vmem:[%s2233_s1 + $0x318] sm:$0xff]  }
  0x38   :  { %1570 = vmatprep.subr.bf16.mxu0 %v1756_v0 }
  0x39   :  { %1597 = vmatpush3.bf16.msra.mxu1 %v1754_v62 }
  0x3a   :  { %1598 = vmatprep.subr.bf16.mxu1 %v1758_v2 }
  0x3b   :  { %1571 = vmatpush3.bf16.msra.mxu0 %v1757_v1 }
  0x3c   :  { %1572 = vmatprep.subr.bf16.mxu0 %v1760_v4 }
  0x3d   :  { %1599 = vmatpush3.bf16.msra.mxu1 %v1759_v3 }
  0x3e   :  { %1600 = vmatprep.subr.bf16.mxu1 %v1762_v6 }
  0x3f   :  { %1573 = vmatpush3.bf16.msra.mxu0 %v1761_v5 }
  0x40   :  { %1614 = vmatprep.subr.bf16.mxu0 %v1767_v10 }
  0x41   :  { %1601 = vmatpush3.bf16.msra.mxu1 %v1766_v9 }
  0x42   :  { %1118 = vmatmul.mubr.bf16.vlgmr.msra.gmra.mrb[8].mxu0 %v1763_v7  ;;  %1642 = vmatprep.subr.bf16.mxu1 %v1772_v14 }
  0x43   :  { %1615 = vmatpush3.bf16.msra.mxu0 %v1771_v13  ;;  %1125 = vmatprep.mubr.bf16.mxu0 %v1777_v19 }
  0x44   :  { %1167 = vmatmul.mubr.bf16.vlgmr.msra.gmra.mrb[8].mxu1 %v1768_v11  ;;  %1616 = vmatprep.subr.bf16.mxu0 %v1774_v16 }
  0x45   :  { %1643 = vmatpush3.bf16.msra.mxu1 %v1773_v15  ;;  %1174 = vmatprep.mubr.bf16.mxu1 %v1782_v23 }
  0x46   :  { %1644 = vmatprep.subr.bf16.mxu1 %v1776_v18 }
  0x47   :  { %1617 = vmatpush3.bf16.msra.mxu0 %v1775_v17 }
  0x48   :  { %1618 = vmatprep.subr.bf16.mxu0 %v1781_v22 }
  0x49   :  { %1645 = vmatpush3.bf16.msra.mxu1 %v1779_v20 }
  0x4a   :  { %1126 = vmatmul.mubr.bf16.gmra.mrb[12].mxu0 %v1780_v21  ;;  %1646 = vmatprep.subr.bf16.mxu1 %v1786_v26 }
  0x4b   :  { %1619 = vmatpush3.bf16.msra.mxu0 %v1784_v24  ;;  %1215 = vmatprep.mubr.bf16.mxu0 %v1809_v48 }
  0x4c   :  { %1175 = vmatmul.mubr.bf16.gmra.mrb[12].mxu1 %v1785_v25  ;;  %1620 = vmatprep.subr.bf16.mxu0 %v1788_v28 }
  0x4d   :  { %1647 = vmatpush3.bf16.msra.mxu1 %v1787_v27  ;;  %1264 = vmatprep.mubr.bf16.mxu1 %v1814_v52 }
  0x4e   :  { %1648 = vmatprep.subr.bf16.mxu1 %v1790_v30 }
  0x4f   :  { %1621 = vmatpush3.bf16.msra.mxu0 %v1789_v29 }
  0x50   :  { %1622 = vmatprep.subr.bf16.mxu0 %v1792_v32 }
  0x51   :  { %1649 = vmatpush3.bf16.msra.mxu1 %v1791_v31 }
  0x52   :  { %1650 = vmatprep.subr.bf16.mxu1 %v1794_v34 }
  0x53   :  { %1623 = vmatpush3.bf16.msra.mxu0 %v1793_v33 }
  0x54   :  { %1624 = vmatprep.subr.bf16.mxu0 %v1796_v36 }
  0x55   :  { %1651 = vmatpush3.bf16.msra.mxu1 %v1795_v35 }
  0x56   :  { %1652 = vmatprep.subr.bf16.mxu1 %v1798_v38 }
  0x57   :  { %1625 = vmatpush3.bf16.msra.mxu0 %v1797_v37 }
  0x58   :  { %1626 = vmatprep.subr.bf16.mxu0 %v1800_v40 }
  0x59   :  { %1653 = vmatpush3.bf16.msra.mxu1 %v1799_v39 }
  0x5a   :  { %1654 = vmatprep.subr.bf16.mxu1 %v1802_v42 }
  0x5b   :  { %1627 = vmatpush3.bf16.msra.mxu0 %v1801_v41 }
  0x5c   :  { %1628 = vmatprep.subr.bf16.mxu0 %v1804_v44 }
  0x5d   :  { %1655 = vmatpush3.bf16.msra.mxu1 %v1803_v43 }
  0x5e   :  { %1656 = vmatprep.subr.bf16.mxu1 %v1806_v46 }
  0x5f   :  { %1629 = vmatpush3.bf16.msra.mxu0 %v1805_v45 }
  0x60   :  { %1676 = vmatprep.subr.bf16.mxu0 %v1811_v50 }
  0x61   :  { %1657 = vmatpush3.bf16.msra.mxu1 %v1810_v49 }
  0x62   :  { %1216 = vmatmul.mubr.bf16.vlgmr.msra.gmra.mrb[16].mxu0 %v1807_v47 }
  0x63   :  { %1677 = vmatpush3.bf16.msra.mxu0 %v1811_v50  ;;  %1223 = vmatprep.mubr.bf16.mxu0 %v1816_v54 }
  0x64   :  { %1265 = vmatmul.mubr.bf16.vlgmr.msra.gmra.mrb[16].mxu1 %v1812_v51  ;;  %1678 = vmatprep.subr.bf16.mxu0 %v1815_v53 }
  0x65   :  { %1272 = vmatprep.mubr.bf16.mxu1 %v1820_v57 }
  0x67   :  { %1679 = vmatpush3.bf16.msra.mxu0 %v1815_v53 }
  0x68   :  { %1680 = vmatprep.subr.bf16.mxu0 %v1819_v56 }
  0x6a   :  { %1224 = vmatmul.mubr.bf16.gmra.mrb[20].mxu0 %v1818_v55 }
  0x6b   :  { %1684 = vmatprep.mubr.msk.bf16.mxu0 %vm980_vm0, %v1824_v59  ;;  %1681 = vmatpush3.bf16.msra.mxu0 %v1819_v56 }
  0x6c   :  { %1682 = vmatprep.subr.bf16.mxu0 %v1823_v58  ;;  %1273 = vmatmul.mubr.bf16.gmra.mrb[20].mxu1 %v1822_v60 }
  0x6f   :  { %1683 = vmatpush3.bf16.msra.mxu0 %v1823_v58 }
  0x72   :  { %1685 = vmatmul.mubr.msk.bf16.vlgmr.msra.gmra.mrb[24].mxu0 %vm980_vm0, %v1825_v61 }
  0xf5   :  { %v1518_v62 = vpop.f32.mrb[0].mxu0 }
  0xf6   :  { %v1519_v0 = vpop.f32.mrb[1].mxu0 }
  0xf7   :  { %v1520_v1 = vadd.f32 %v1519_v0, %v1518_v62  ;;  %v1521_v2 = vpop.f32.mrb[2].mxu0  ;;  %v1546_v3 = vpop.f32.mrb[0].mxu1 }
  0xf8   :  { %v1522_v4 = vpop.f32.mrb[3].mxu0  ;;  %v1547_v7 = vpop.f32.mrb[1].mxu1 }
  0xf9   :  { %v1022_v5 = vadd.f32 %v1520_v1, %v1354_v63  ;;  %v1523_v6 = vadd.f32 %v1522_v4, %v1521_v2  ;;  %v1548_v8 = vadd.f32 %v1547_v7, %v1546_v3  ;;  %v1549_v9 = vpop.f32.mrb[2].mxu1 }
  0xfa   :  { %v1550_v11 = vpop.f32.mrb[3].mxu1 }
  0xfb   :  { %v1025_v10 = vadd.f32 %v1523_v6, %v1354_v63  ;;  %v1071_v12 = vadd.f32 %v1548_v8, %v1022_v5  ;;  %v1551_v13 = vadd.f32 %v1550_v11, %v1549_v9 }
  0xfd   :  { %v1074_v14 = vadd.f32 %v1551_v13, %v1025_v10  ;;  %v1524_v15 = vpop.f32.mrb[4].mxu0 }
  0xfe   :  { %v1525_v16 = vpop.f32.mrb[5].mxu0 }
  0xff   :  { %v1526_v17 = vadd.f32 %v1525_v16, %v1524_v15  ;;  %v1527_v18 = vpop.f32.mrb[6].mxu0  ;;  %v1552_v19 = vpop.f32.mrb[4].mxu1 }
 0x100   :  { %v1528_v20 = vpop.f32.mrb[7].mxu0  ;;  %v1553_v23 = vpop.f32.mrb[5].mxu1 }
 0x101   :  { %v1030_v21 = vadd.f32 %v1526_v17, %v1354_v63  ;;  %v1529_v22 = vadd.f32 %v1528_v20, %v1527_v18  ;;  %v1554_v24 = vadd.f32 %v1553_v23, %v1552_v19  ;;  %v1555_v25 = vpop.f32.mrb[6].mxu1 }
 0x102   :  { %v1556_v27 = vpop.f32.mrb[7].mxu1 }
 0x103   :  { %v1033_v26 = vadd.f32 %v1529_v22, %v1354_v63  ;;  %v1079_v28 = vadd.f32 %v1554_v24, %v1030_v21  ;;  %v1557_v29 = vadd.f32 %v1556_v27, %v1555_v25 }
 0x105   :  { %v1082_v30 = vadd.f32 %v1557_v29, %v1033_v26 }
 0x115   :  { %v1574_v31 = vpop.f32.mrb[8].mxu0 }
 0x116   :  { %v1575_v32 = vpop.f32.mrb[9].mxu0 }
 0x117   :  { %v1576_v33 = vadd.f32 %v1575_v32, %v1574_v31  ;;  %v1577_v34 = vpop.f32.mrb[10].mxu0  ;;  %v1602_v35 = vpop.f32.mrb[8].mxu1 }
 0x118   :  { %v1578_v36 = vpop.f32.mrb[11].mxu0  ;;  %v1603_v39 = vpop.f32.mrb[9].mxu1 }
 0x119   :  { %v1120_v37 = vadd.f32 %v1576_v33, %v1071_v12  ;;  %v1579_v38 = vadd.f32 %v1578_v36, %v1577_v34  ;;  %v1604_v40 = vadd.f32 %v1603_v39, %v1602_v35  ;;  %v1605_v41 = vpop.f32.mrb[10].mxu1 }
 0x11a   :  { %v1606_v43 = vpop.f32.mrb[11].mxu1 }
 0x11b   :  { %v1123_v42 = vadd.f32 %v1579_v38, %v1074_v14  ;;  %v1169_v44 = vadd.f32 %v1604_v40, %v1120_v37  ;;  %v1607_v45 = vadd.f32 %v1606_v43, %v1605_v41 }
 0x11d   :  { %v1172_v46 = vadd.f32 %v1607_v45, %v1123_v42  ;;  %v1580_v47 = vpop.f32.mrb[12].mxu0 }
 0x11e   :  { %v1581_v48 = vpop.f32.mrb[13].mxu0 }
 0x11f   :  { %v1582_v49 = vadd.f32 %v1581_v48, %v1580_v47  ;;  %v1583_v50 = vpop.f32.mrb[14].mxu0  ;;  %v1608_v51 = vpop.f32.mrb[12].mxu1 }
 0x120   :  { %v1584_v52 = vpop.f32.mrb[15].mxu0  ;;  %v1609_v55 = vpop.f32.mrb[13].mxu1 }
 0x121   :  { %v1128_v53 = vadd.f32 %v1582_v49, %v1079_v28  ;;  %v1585_v54 = vadd.f32 %v1584_v52, %v1583_v50  ;;  %v1610_v56 = vadd.f32 %v1609_v55, %v1608_v51  ;;  %v1611_v57 = vpop.f32.mrb[14].mxu1 }
 0x122   :  { %v1612_v59 = vpop.f32.mrb[15].mxu1 }
 0x123   :  { %v1131_v58 = vadd.f32 %v1585_v54, %v1082_v30  ;;  %v1177_v60 = vadd.f32 %v1610_v56, %v1128_v53  ;;  %v1613_v61 = vadd.f32 %v1612_v59, %v1611_v57 }
 0x125   :  { %v1180_v62 = vadd.f32 %v1613_v61, %v1131_v58 }
 0x135   :  { %v1630_v63 = vpop.f32.mrb[16].mxu0 }
 0x136   :  { %v1631_v0 = vpop.f32.mrb[17].mxu0 }
 0x137   :  { %v1632_v1 = vadd.f32 %v1631_v0, %v1630_v63  ;;  %v1633_v2 = vpop.f32.mrb[18].mxu0  ;;  %v1658_v5 = vpop.f32.mrb[16].mxu1 }
 0x138   :  { %v1634_v3 = vpop.f32.mrb[19].mxu0  ;;  %v1659_v7 = vpop.f32.mrb[17].mxu1 }
 0x139   :  { %v1218_v4 = vadd.f32 %v1632_v1, %v1169_v44  ;;  %v1635_v6 = vadd.f32 %v1634_v3, %v1633_v2  ;;  %v1660_v9 = vadd.f32 %v1659_v7, %v1658_v5  ;;  %v1661_v10 = vpop.f32.mrb[18].mxu1 }
 0x13a   :  { %v1662_v11 = vpop.f32.mrb[19].mxu1 }
 0x13b   :  { %v1221_v8 = vadd.f32 %v1635_v6, %v1172_v46  ;;  %v1663_v12 = vadd.f32 %v1662_v11, %v1661_v10  ;;  %v1267_v14 = vadd.f32 %v1660_v9, %v1218_v4 }
 0x13d   :  { %v1636_v13 = vpop.f32.mrb[20].mxu0  ;;  %v1270_v18 = vadd.f32 %v1663_v12, %v1221_v8 }
 0x13e   :  { %v1637_v15 = vpop.f32.mrb[21].mxu0 }
 0x13f   :  { %v1638_v16 = vadd.f32 %v1637_v15, %v1636_v13  ;;  %v1639_v17 = vpop.f32.mrb[22].mxu0  ;;  %v1664_v21 = vpop.f32.mrb[20].mxu1 }
 0x140   :  { %v1640_v19 = vpop.f32.mrb[23].mxu0  ;;  %v1665_v23 = vpop.f32.mrb[21].mxu1 }
 0x141   :  { %v1226_v20 = vadd.f32 %v1638_v16, %v1177_v60  ;;  %v1641_v22 = vadd.f32 %v1640_v19, %v1639_v17  ;;  %v1666_v25 = vadd.f32 %v1665_v23, %v1664_v21  ;;  %v1667_v26 = vpop.f32.mrb[22].mxu1 }
 0x142   :  { %v1668_v27 = vpop.f32.mrb[23].mxu1 }
 0x143   :  { %v1229_v24 = vadd.f32 %v1641_v22, %v1180_v62  ;;  %v1669_v28 = vadd.f32 %v1668_v27, %v1667_v26  ;;  %v1275_v29 = vadd.f32 %v1666_v25, %v1226_v20 }
 0x145   :  { %v1686_v30 = vpop.f32.mrb[24].mxu0  ;;  %v1278_v33 = vadd.f32 %v1669_v28, %v1229_v24 }
 0x146   :  { %v1324_v31 = vadd.f32 %v1686_v30, %v1275_v29  ;;  %v1315_v32 = vpop.f32.mrb[25].mxu0 }
 0x147   :  { %v1316_v34 = vadd.f32 %v1315_v32, %v1267_v14  ;;  %v1687_v35 = vpop.f32.mrb[26].mxu0 }
 0x148   :  { %v1327_v36 = vadd.f32 %v1687_v35, %v1278_v33  ;;  %v1318_v37 = vpop.f32.mrb[27].mxu0 }
 0x149   :  { %v1319_v38 = vadd.f32 %v1318_v37, %v1270_v18 }
 0x14a   :  { %v1499_v39 = vpack.c.bf16 %v1327_v36, %v1324_v31 }
 0x14b   :  { %v1494_v40 = vpack.c.bf16 %v1319_v38, %v1316_v34 }
 0x14c   :  { %1501 = vst [vmem:[%s2236_s3 + $0x8] sm:$0xff] %v1499_v39  }
 0x14d   :  { %1495 = vst [vmem:[%s2236_s3] sm:$0xff] %v1494_v40  }

// kernel: net_forward.9
= control target key start
LH: loop header
LB: loop body
LE: loop exit
PB: predicated region body
PF: predicated region fallthrough
CT: control target
= control target key end

     0   :  { %v95_v9 = vlaneseq  ;;  %v1160_v10 = vmov 1966171168   ;;  %s1518_s0 = inlined_call_operand.vmem [shape: bf16[2,512], index: 0, kind: input, shape index: {}]   ;;  %s1519_s1 = inlined_call_operand.vmem [shape: bf16[512,256], index: 1, kind: input, shape index: {}]   ;;  %s1520_s2 = inlined_call_operand.vmem [shape: f32[1,256], index: 2, kind: input, shape index: {}]   ;;  %s1521_s3 = inlined_call_operand.vmem [shape: bf16[256,128], index: 3, kind: input, shape index: {}]   ;;  %s1522_s4 = inlined_call_operand.vmem [shape: f32[1,128], index: 4, kind: input, shape index: {}]   ;;  %s1523_s5 = inlined_call_operand.vmem [shape: bf16[128,128], index: 5, kind: input, shape index: {}]   ;;  %s1524_s6 = inlined_call_operand.vmem [shape: f32[1,128], index: 6, kind: input, shape index: {}]   ;;  %s1525_s7 = inlined_call_operand.hbm [shape: f32[2,128], index: 7, kind: output, shape index: {}]  }
   0x1   :  { %v1012_v0 = vld [vmem:[%s1519_s1 + $0x4] ss:$8 sps:$4 sm:$0xff]   ;;  %v1014_v1 = vld [vmem:[%s1519_s1] ss:$8 sps:$4 sm:$0xff]   ;;  %v1015_v2 = vld [vmem:[%s1519_s1 + $0x14] ss:$8 sps:$4 sm:$0xff]   ;;  %v115_v11 = vunpack.c.l.s4 %v1160_v10 }
   0x2   :  { %454 = vmatprep.subr.bf16.mxu0 %v1012_v0  ;;  %v1017_v3 = vld [vmem:[%s1519_s1 + $0x10] ss:$8 sps:$4 sm:$0xff]   ;;  %v1018_v4 = vld [vmem:[%s1519_s1 + $0x24] ss:$8 sps:$4 sm:$0xff]   ;;  %v1020_v5 = vld [vmem:[%s1519_s1 + $0x20] ss:$8 sps:$4 sm:$0xff]  }
   0x3   :  { %455 = vmatpush1.bf16.msra.mxu0 %v1014_v1  ;;  %v1021_v6 = vld [vmem:[%s1519_s1 + $0x34] ss:$8 sps:$4 sm:$0xff]   ;;  %v1023_v7 = vld [vmem:[%s1519_s1 + $0x30] ss:$8 sps:$4 sm:$0xff]   ;;  %v1024_v8 = vld [vmem:[%s1519_s1 + $0x44] ss:$8 sps:$4 sm:$0xff]   ;;  %v116_v15 = vunpack.c.0.s8 %v115_v11 }
   0x4   :  { %456 = vmatprep.subr.bf16.mxu0 %v1015_v2  ;;  %v1026_v12 = vld [vmem:[%s1519_s1 + $0x40] ss:$8 sps:$4 sm:$0xff]   ;;  %v1027_v13 = vld [vmem:[%s1519_s1 + $0x54] ss:$8 sps:$4 sm:$0xff]   ;;  %v1238_v14 = vshrl.u32 %v95_v9, 7 }
   0x5   :  { %v1029_v16 = vld [vmem:[%s1519_s1 + $0x50] ss:$8 sps:$4 sm:$0xff]   ;;  %v1030_v17 = vld [vmem:[%s1519_s1 + $0x64] ss:$8 sps:$4 sm:$0xff]   ;;  %v1032_v21 = vld [vmem:[%s1519_s1 + $0x60] ss:$8 sps:$4 sm:$0xff]  }
   0x6   :  { %v1247_v18 = vsub.s32 %v116_v15, %v1238_v14  ;;  %v1252_v19 = vld.sshfl [vmem:[%s1518_s0] sm:$0x33 pattern:$0x75316420]  ;;  %v1033_v22 = vld [vmem:[%s1519_s1 + $0x74] ss:$8 sps:$4 sm:$0xff]  }
   0x7   :  { %457 = vmatpush1.bf16.msra.mxu0 %v1017_v3  ;;  %v113_v20 = vcombine.high %v1252_v19, %v1252_v19  ;;  %v1035_v24 = vld [vmem:[%s1519_s1 + $0x70] ss:$8 sps:$4 sm:$0xff]   ;;  %v1036_v25 = vld [vmem:[%s1519_s1 + $0x84] ss:$8 sps:$4 sm:$0xff]   ;;  %v1038_v26 = vld [vmem:[%s1519_s1 + $0x80] ss:$8 sps:$4 sm:$0xff]  }
   0x8   :  { %458 = vmatprep.subr.bf16.mxu0 %v1018_v4  ;;  %v1039_v27 = vld [vmem:[%s1519_s1 + $0x94] ss:$8 sps:$4 sm:$0xff]   ;;  %v1041_v28 = vld [vmem:[%s1519_s1 + $0x90] ss:$8 sps:$4 sm:$0xff]   ;;  %v1042_v29 = vld [vmem:[%s1519_s1 + $0xa4] ss:$8 sps:$4 sm:$0xff]   ;;  %v1358_v54 = vrot.slane %v1252_v19, %v1247_v18 }
   0x9   :  { %v1263_v23 = vrot.slane %v113_v20, %v1247_v18  ;;  %v1044_v30 = vld [vmem:[%s1519_s1 + $0xa0] ss:$8 sps:$4 sm:$0xff]   ;;  %v1045_v31 = vld [vmem:[%s1519_s1 + $0xb4] ss:$8 sps:$4 sm:$0xff]   ;;  %v1047_v32 = vld [vmem:[%s1519_s1 + $0xb0] ss:$8 sps:$4 sm:$0xff]  }
   0xa   :  { %v1048_v33 = vld [vmem:[%s1519_s1 + $0xc4] ss:$8 sps:$4 sm:$0xff]   ;;  %v1050_v35 = vld [vmem:[%s1519_s1 + $0xc0] ss:$8 sps:$4 sm:$0xff]   ;;  %v1051_v37 = vld [vmem:[%s1519_s1 + $0xd4] ss:$8 sps:$4 sm:$0xff]  }
   0xb   :  { %459 = vmatpush1.bf16.msra.mxu0 %v1020_v5  ;;  %486 = vmatprep.mubr.bf16.mxu0 %v1263_v23  ;;  %v1108_v34 = vld [vmem:[%s1521_s3 + $0x40] sm:$0xff]   ;;  %v1110_v38 = vld [vmem:[%s1521_s3 + $0x48] sm:$0xff]   ;;  %v1112_v40 = vld [vmem:[%s1521_s3 + $0x50] sm:$0xff]   ;;  %v129_v55 = vcombine.high %v1263_v23, %v1263_v23 }
   0xc   :  { %460 = vmatprep.subr.bf16.mxu0 %v1021_v6  ;;  %v1109_v36 = vld [vmem:[%s1521_s3] sm:$0xff]   ;;  %951 = vmatprep.subr.bf16.mxu1 %v1108_v34  ;;  %v1111_v39 = vld [vmem:[%s1521_s3 + $0x8] sm:$0xff]   ;;  %v1053_v41 = vld [vmem:[%s1519_s1 + $0xd0] ss:$8 sps:$4 sm:$0xff]  }
   0xd   :  { %952 = vmatpush3.bf16.msra.mxu1 %v1109_v36  ;;  %v1054_v42 = vld [vmem:[%s1519_s1 + $0xe4] ss:$8 sps:$4 sm:$0xff]   ;;  %v1113_v43 = vld [vmem:[%s1521_s3 + $0x10] sm:$0xff]   ;;  %v1114_v44 = vld [vmem:[%s1521_s3 + $0x58] sm:$0xff]  }
   0xe   :  { %953 = vmatprep.subr.bf16.mxu1 %v1110_v38  ;;  %v1056_v45 = vld [vmem:[%s1519_s1 + $0xe0] ss:$8 sps:$4 sm:$0xff]   ;;  %v1057_v46 = vld [vmem:[%s1519_s1 + $0xf4] ss:$8 sps:$4 sm:$0xff]   ;;  %v1059_v49 = vld [vmem:[%s1519_s1 + $0xf0] ss:$8 sps:$4 sm:$0xff]  }
   0xf   :  { %461 = vmatpush1.bf16.msra.mxu0 %v1023_v7  ;;  %v1115_v47 = vld [vmem:[%s1521_s3 + $0x18] sm:$0xff]   ;;  %v1116_v48 = vld [vmem:[%s1521_s3 + $0x60] sm:$0xff]   ;;  %v1118_v52 = vld [vmem:[%s1521_s3 + $0x68] sm:$0xff]  }
  0x10   :  { %462 = vmatprep.subr.bf16.mxu0 %v1024_v8  ;;  %v1117_v50 = vld [vmem:[%s1521_s3 + $0x20] sm:$0xff]  }
  0x11   :  { %954 = vmatpush3.bf16.msra.mxu1 %v1111_v39  ;;  %v1062_v51 = vld [vmem:[%s1519_s1 + $0x104] ss:$8 sps:$4 sm:$0xff]   ;;  %v1060_v53 = vld [vmem:[%s1519_s1 + $0x100] ss:$8 sps:$4 sm:$0xff]  }
  0x12   :  { %955 = vmatprep.subr.bf16.mxu1 %v1112_v40 }
  0x13   :  { %463 = vmatpush1.bf16.msra.mxu0 %v1026_v12 }
  0x14   :  { %464 = vmatprep.subr.bf16.mxu0 %v1027_v13 }
  0x15   :  { %956 = vmatpush3.bf16.msra.mxu1 %v1113_v43 }
  0x16   :  { %957 = vmatprep.subr.bf16.mxu1 %v1114_v44 }
  0x17   :  { %465 = vmatpush1.bf16.msra.mxu0 %v1029_v16 }
  0x18   :  { %466 = vmatprep.subr.bf16.mxu0 %v1030_v17 }
  0x19   :  { %958 = vmatpush3.bf16.msra.mxu1 %v1115_v47 }
  0x1a   :  { %959 = vmatprep.subr.bf16.mxu1 %v1116_v48 }
  0x1b   :  { %467 = vmatpush1.bf16.msra.mxu0 %v1032_v21 }
  0x1c   :  { %468 = vmatprep.subr.bf16.mxu0 %v1033_v22 }
  0x1d   :  { %960 = vmatpush3.bf16.msra.mxu1 %v1117_v50 }
  0x1f   :  { %469 = vmatpush1.bf16.msra.mxu0 %v1035_v24 }
  0x20   :  { %470 = vmatprep.subr.bf16.mxu0 %v1036_v25 }
  0x23   :  { %471 = vmatpush1.bf16.msra.mxu0 %v1038_v26 }
  0x24   :  { %472 = vmatprep.subr.bf16.mxu0 %v1039_v27 }
  0x27   :  { %473 = vmatpush1.bf16.msra.mxu0 %v1041_v28 }
  0x28   :  { %474 = vmatprep.subr.bf16.mxu0 %v1042_v29 }
  0x2b   :  { %475 = vmatpush1.bf16.msra.mxu0 %v1044_v30 }
  0x2c   :  { %476 = vmatprep.subr.bf16.mxu0 %v1045_v31 }
  0x2f   :  { %477 = vmatpush1.bf16.msra.mxu0 %v1047_v32 }
  0x30   :  { %478 = vmatprep.subr.bf16.mxu0 %v1048_v33 }
  0x33   :  { %479 = vmatpush1.bf16.msra.mxu0 %v1050_v35 }
  0x34   :  { %480 = vmatprep.subr.bf16.mxu0 %v1051_v37 }
  0x37   :  { %481 = vmatpush1.bf16.msra.mxu0 %v1053_v41 }
  0x38   :  { %482 = vmatprep.subr.bf16.mxu0 %v1054_v42 }
  0x3b   :  { %483 = vmatpush1.bf16.msra.mxu0 %v1056_v45 }
  0x3c   :  { %484 = vmatprep.subr.bf16.mxu0 %v1057_v46 }
  0x3f   :  { %485 = vmatpush1.bf16.msra.mxu0 %v1059_v49 }
  0x40   :  { %12 = vsyncpa [#allocation3], 0  ;;  %495 = vmatprep.subr.bf16.mxu0 %v1062_v51  ;;  %v1065_v56 = vld [vmem:[%s1519_s1 + $0x114] ss:$8 sps:$4 sm:$0xff]   ;;  %961 = vmatprep.subr.bf16.mxu1 %v1118_v52  ;;  %v1119_v57 = vld [vmem:[%s1521_s3 + $0x28] sm:$0xff]   ;;  %v128_v25 = vcombine.high %v1358_v54, %v1358_v54  ;;  %v1161_v30 = vmov 0.0  }
  0x41   :  { %v1063_v58 = vld [vmem:[%s1519_s1 + $0x110] ss:$8 sps:$4 sm:$0xff]   ;;  %v1068_v59 = vld [vmem:[%s1519_s1 + $0x124] ss:$8 sps:$4 sm:$0xff]   ;;  %962 = vmatpush3.bf16.msra.mxu1 %v1119_v57  ;;  %v1066_v60 = vld [vmem:[%s1519_s1 + $0x120] ss:$8 sps:$4 sm:$0xff]  }
  0x42   :  { %487 = vmatmul.mubr.bf16.vlgmr.msra.gmra.mrb[0].mxu0 %v1358_v54  ;;  %v1071_v61 = vld [vmem:[%s1519_s1 + $0x134] ss:$8 sps:$4 sm:$0xff]   ;;  %v1069_v62 = vld [vmem:[%s1519_s1 + $0x130] ss:$8 sps:$4 sm:$0xff]   ;;  %v1074_v63 = vld [vmem:[%s1519_s1 + $0x144] ss:$8 sps:$4 sm:$0xff]  }
  0x43   :  { %496 = vmatpush1.bf16.msra.mxu0 %v1060_v53  ;;  %527 = vmatprep.mubr.bf16.mxu0 %v129_v55  ;;  %v1072_v0 = vld [vmem:[%s1519_s1 + $0x140] ss:$8 sps:$4 sm:$0xff]   ;;  %v1077_v1 = vld [vmem:[%s1519_s1 + $0x154] ss:$8 sps:$4 sm:$0xff]   ;;  %v1075_v2 = vld [vmem:[%s1519_s1 + $0x150] ss:$8 sps:$4 sm:$0xff]  }
  0x44   :  { %497 = vmatprep.subr.bf16.mxu0 %v1065_v56  ;;  %v1080_v3 = vld [vmem:[%s1519_s1 + $0x164] ss:$8 sps:$4 sm:$0xff]   ;;  %v1078_v4 = vld [vmem:[%s1519_s1 + $0x160] ss:$8 sps:$4 sm:$0xff]   ;;  %v1083_v5 = vld [vmem:[%s1519_s1 + $0x174] ss:$8 sps:$4 sm:$0xff]  }
  0x45   :  { %v1081_v6 = vld [vmem:[%s1519_s1 + $0x170] ss:$8 sps:$4 sm:$0xff]   ;;  %v1086_v7 = vld [vmem:[%s1519_s1 + $0x184] ss:$8 sps:$4 sm:$0xff]   ;;  %v1084_v8 = vld [vmem:[%s1519_s1 + $0x180] ss:$8 sps:$4 sm:$0xff]  }
  0x46   :  { %v1089_v10 = vld [vmem:[%s1519_s1 + $0x194] ss:$8 sps:$4 sm:$0xff]   ;;  %v1087_v11 = vld [vmem:[%s1519_s1 + $0x190] ss:$8 sps:$4 sm:$0xff]   ;;  %v1092_v12 = vld [vmem:[%s1519_s1 + $0x1a4] ss:$8 sps:$4 sm:$0xff]  }
  0x47   :  { %498 = vmatpush1.bf16.msra.mxu0 %v1063_v58  ;;  %v1090_v13 = vld [vmem:[%s1519_s1 + $0x1a0] ss:$8 sps:$4 sm:$0xff]   ;;  %v1095_v15 = vld [vmem:[%s1519_s1 + $0x1b4] ss:$8 sps:$4 sm:$0xff]   ;;  %v1093_v16 = vld [vmem:[%s1519_s1 + $0x1b0] ss:$8 sps:$4 sm:$0xff]  }
  0x48   :  { %499 = vmatprep.subr.bf16.mxu0 %v1068_v59  ;;  %v1098_v17 = vld [vmem:[%s1519_s1 + $0x1c4] ss:$8 sps:$4 sm:$0xff]   ;;  %v1096_v18 = vld [vmem:[%s1519_s1 + $0x1c0] ss:$8 sps:$4 sm:$0xff]   ;;  %v1101_v19 = vld [vmem:[%s1519_s1 + $0x1d4] ss:$8 sps:$4 sm:$0xff]  }
  0x49   :  { %v1099_v20 = vld [vmem:[%s1519_s1 + $0x1d0] ss:$8 sps:$4 sm:$0xff]   ;;  %v1104_v21 = vld [vmem:[%s1519_s1 + $0x1e4] ss:$8 sps:$4 sm:$0xff]   ;;  %v1102_v22 = vld [vmem:[%s1519_s1 + $0x1e0] ss:$8 sps:$4 sm:$0xff]  }
  0x4a   :  { %v1107_v23 = vld [vmem:[%s1519_s1 + $0x1f4] ss:$8 sps:$4 sm:$0xff]   ;;  %v1105_v24 = vld [vmem:[%s1519_s1 + $0x1f0] ss:$8 sps:$4 sm:$0xff]   ;;  %v97_v31 = vsub.s32 0, %v1238_v14  ;;  %v101_v33 = vsub.s32 1, %v1238_v14 }
  0x4b   :  { %500 = vmatpush1.bf16.msra.mxu0 %v1066_v60  ;;  %v1120_v26 = vld [vmem:[%s1521_s3 + $0x70] sm:$0xff]   ;;  %v1122_v28 = vld [vmem:[%s1521_s3 + $0x78] sm:$0xff]   ;;  %v93_v32 = vld [vmem:[%s1520_s2] sm:$0x3]  ;;  %vm1162_vm0 = vmmov 0   ;;  %vm832_vm2 = vcmask 1041408  }
  0x4c   :  { %501 = vmatprep.subr.bf16.mxu0 %v1071_v61  ;;  %v1121_v27 = vld [vmem:[%s1521_s3 + $0x30] sm:$0xff]   ;;  %963 = vmatprep.subr.bf16.mxu1 %v1120_v26  ;;  %v1123_v29 = vld [vmem:[%s1521_s3 + $0x38] sm:$0xff]   ;;  %v98_v34 = vrot.slane %v93_v32, %v97_v31  ;;  %v102_v35 = vrot.slane %v93_v32, %v101_v33  ;;  %v1124_v45 = vld [vmem:[%s1523_s5] sm:$0xff]  }
  0x4d   :  { %964 = vmatpush3.bf16.msra.mxu1 %v1121_v27  ;;  %v1125_v14 = vld [vmem:[%s1523_s5 + $0x8] sm:$0xff]   ;;  %v1126_v47 = vld [vmem:[%s1523_s5 + $0x10] sm:$0xff]   ;;  %v1127_v48 = vld [vmem:[%s1523_s5 + $0x18] sm:$0xff]  }
  0x4e   :  { %965 = vmatprep.subr.bf16.mxu1 %v1122_v28  ;;  %v1128_v49 = vld [vmem:[%s1523_s5 + $0x20] sm:$0xff]   ;;  %v1129_v50 = vld [vmem:[%s1523_s5 + $0x28] sm:$0xff]   ;;  %v1130_v51 = vld [vmem:[%s1523_s5 + $0x30] sm:$0xff]  }
  0x4f   :  { %502 = vmatpush1.bf16.msra.mxu0 %v1069_v62  ;;  %v1131_v52 = vld [vmem:[%s1523_s5 + $0x38] sm:$0xff]   ;;  %v925_v54 = vld [vmem:[%s1522_s4] ss:$0 sm:$0xff]  ;;  %v829_v62 = vand.u32 127, %v95_v9  ;;  %s1163_s4 = smov [#allocation2]  }
  0x50   :  { %503 = vmatprep.subr.bf16.mxu0 %v1074_v63  ;;  %v942_v63 = vld [vmem:[%s1524_s6] ss:$0 sm:$0xff]  ;;  %s852_s6 = sshll.u32 %s1163_s4, 4  ;;  %s853_s6 = int_to_ptr.vmem [resolvable:$true] %s852_s6 }
  0x51   :  { %966 = vmatpush3.bf16.msra.mxu1 %v1123_v29  ;;  %vm830_vm1 = vcmp.lt.s32.totalorder %v829_v62, 10  ;;  %s1136_s13 = scalar_lea.vmem %s853_s6, 32  ;;  %p1141_p1 = scmp.lt.s32.totalorder %s853_s6, %s853_s6 }
  0x52   :  { %982 = vmatprep.subr.bf16.mxu1 %v1161_v30  ;;  %p1137_p0 = scmp.ne.s32.totalorder %s853_s6, %s1136_s13  ;;  %p1142_p2 = scmp.lt.s32.totalorder %s1136_s13, %s1136_s13 }
  0x53   :  { %504 = vmatpush1.bf16.msra.mxu0 %v1072_v0 }
  0x54   :  { %505 = vmatprep.subr.bf16.mxu0 %v1077_v1  ;;  %p1143_p3 = por %p1142_p2, %p1141_p1 }
  0x56   :  { %p1144_p4 = pnand %p1143_p3, %p1137_p0 }
  0x57   :  { %506 = vmatpush1.bf16.msra.mxu0 %v1075_v2 }
  0x58   :  { %507 = vmatprep.subr.bf16.mxu0 %v1080_v3 }
  0x5b   :  { %508 = vmatpush1.bf16.msra.mxu0 %v1078_v4 }
  0x5c   :  { %509 = vmatprep.subr.bf16.mxu0 %v1083_v5 }
  0x5f   :  { %510 = vmatpush1.bf16.msra.mxu0 %v1081_v6 }
  0x60   :  { %511 = vmatprep.subr.bf16.mxu0 %v1086_v7 }
  0x63   :  { %512 = vmatpush1.bf16.msra.mxu0 %v1084_v8 }
  0x64   :  { %513 = vmatprep.subr.bf16.mxu0 %v1089_v10 }
  0x67   :  { %514 = vmatpush1.bf16.msra.mxu0 %v1087_v11 }
  0x68   :  { %515 = vmatprep.subr.bf16.mxu0 %v1092_v12 }
  0x6b   :  { %516 = vmatpush1.bf16.msra.mxu0 %v1090_v13 }
  0x6c   :  { %517 = vmatprep.subr.bf16.mxu0 %v1095_v15 }
  0x6f   :  { %518 = vmatpush1.bf16.msra.mxu0 %v1093_v16 }
  0x70   :  { %519 = vmatprep.subr.bf16.mxu0 %v1098_v17 }
  0x73   :  { %520 = vmatpush1.bf16.msra.mxu0 %v1096_v18 }
  0x74   :  { %521 = vmatprep.subr.bf16.mxu0 %v1101_v19 }
  0x77   :  { %522 = vmatpush1.bf16.msra.mxu0 %v1099_v20 }
  0x78   :  { %523 = vmatprep.subr.bf16.mxu0 %v1104_v21 }
  0x7b   :  { %524 = vmatpush1.bf16.msra.mxu0 %v1102_v22 }
  0x7c   :  { %525 = vmatprep.subr.bf16.mxu0 %v1107_v23 }
  0x7f   :  { %526 = vmatpush1.bf16.msra.mxu0 %v1105_v24 }
  0x82   :  { %528 = vmatmul.mubr.bf16.vlgmr.msra.gmra.mrb[0].mxu0 %v128_v25 }
 0x155   :  { %v529_v36 = vpop.f32.mrb[0].mxu0 }
 0x156   :  { %v1002_v37 = vadd.f32 %v529_v36, %v98_v34  ;;  %v531_v38 = vpop.f32.mrb[1].mxu0 }
 0x157   :  { %v1003_v39 = vadd.f32 %v531_v38, %v102_v35  ;;  %v533_v40 = vpop.f32.mrb[2].mxu0 }
 0x158   :  { %v536_v41 = vmax.f32 %v1002_v37, 0.0  ;;  %v534_v42 = vpop.f32.mrb[3].mxu0 }
 0x159   :  { %v537_v43 = vmax.f32 %v1003_v39, 0.0 }
 0x15a   :  { %v538_v46 = vpack.c.bf16 %v536_v41, %v536_v41 }
 0x15b   :  { %v539_v44 = vpack.c.bf16 %v537_v43, %v537_v43 }
 0x15d   :  { %707 = vmatprep.mubr.bf16.mxu1 %v539_v44 }
 0x15e   :  { %708 = vmatmul.mubr.bf16.vlgmr.msra.gmra.mrb[0].mxu1 %v538_v46 }
 0x15f   :  { %983 = vmatpush3.bf16.msra.mxu1 %v1124_v45  ;;  %998 = vmatprep.mubr.msk.bf16.mxu1 %vm1162_vm0, %v1161_v30 }
 0x160   :  { %984 = vmatprep.subr.bf16.mxu1 %v1161_v30 }
 0x163   :  { %985 = vmatpush3.bf16.msra.mxu1 %v1125_v14 }
 0x164   :  { %986 = vmatprep.subr.bf16.mxu1 %v1161_v30 }
 0x167   :  { %987 = vmatpush3.bf16.msra.mxu1 %v1126_v47 }
 0x168   :  { %988 = vmatprep.subr.bf16.mxu1 %v1161_v30 }
 0x16b   :  { %989 = vmatpush3.bf16.msra.mxu1 %v1127_v48 }
 0x16c   :  { %990 = vmatprep.subr.bf16.mxu1 %v1161_v30 }
 0x16f   :  { %991 = vmatpush3.bf16.msra.mxu1 %v1128_v49 }
 0x170   :  { %992 = vmatprep.subr.bf16.mxu1 %v1161_v30 }
 0x173   :  { %993 = vmatpush3.bf16.msra.mxu1 %v1129_v50 }
 0x174   :  { %994 = vmatprep.subr.bf16.mxu1 %v1161_v30 }
 0x177   :  { %995 = vmatpush3.bf16.msra.mxu1 %v1130_v51 }
 0x178   :  { %996 = vmatprep.subr.bf16.mxu1 %v1161_v30 }
 0x17b   :  { %997 = vmatpush3.bf16.msra.mxu1 %v1131_v52 }
 0x231   :  { %v967_v53 = vpop.f32.mrb[0].mxu1 }
 0x232   :  { %v968_v55 = vpop.f32.mrb[1].mxu1 }
 0x233   :  { %v969_v56 = vadd.f32 %v968_v55, %v967_v53  ;;  %v970_v57 = vpop.f32.mrb[2].mxu1 }
 0x234   :  { %v971_v58 = vpop.f32.mrb[3].mxu1 }
 0x235   :  { %v710_v59 = vadd.f32 %v969_v56, %v925_v54 }
 0x237   :  { %v715_v60 = vmax.f32 %v710_v59, 0.0 }
 0x239   :  { %v716_v61 = vpack.c.bf16 %v715_v60, %v715_v60 }
 0x23b   :  { %999 = vmatmul.mubr.bf16.vlgmr.msra.gmra.mrb[4].mxu1 %v716_v61 }
 0x30e   :  { %v822_v0 = vpop.f32.mrb[4].mxu1 }
 0x30f   :  { %v823_v1 = vadd.f32 %v942_v63, %v822_v0  ;;  %v1000_v2 = vpop.f32.mrb[5].mxu1 }
 0x310   :  { %v825_v3 = vpop.f32.mrb[6].mxu1 }
 0x311   :  { %v1001_v4 = vpop.f32.mrb[7].mxu1  ;;  %v831_v5 = vsel %vm830_vm1, %v823_v1, -1e+30 }
 0x312   :  { %v833_v6 = vsel %vm832_vm2, %v831_v5, -inf }
 0x313   :  { %834 = vmax.xlane.f32.xlu0 %v833_v6 }
 0x3a0   :  { %v835_v7 = vpop.xlane.xlu0 %834 }
 0x3a1   :  { %v836_v8 = vsub.f32 %v831_v5, %v835_v7 }
 0x3a3   :  { %v837_v10 = vmul.f32 1.442695, %v836_v8 }
 0x3a5   :  { %1132 = vpow2.f32 %v837_v10 }
 0x3af   :  { %v1133_v11 = vpop.eup %1132 }
 0x3b0   :  { %v839_v9 = vsel %vm832_vm2, %v1133_v11, 0.0 }
 0x3b1   :  { %840 = vadd.xlane.f32.xlu0 %v839_v9 }
 0x43e   :  { %v841_v12 = vpop.xlane.xlu0 %840 }
 0x43f   :  { %1134 = vlog2.f32 %v841_v12 }
 0x449   :  { %v1135_v13 = vpop.eup %1134 }
 0x44a   :  { %v843_v15 = vmul.f32 0.6931472, %v1135_v13 }
 0x44c   :  { %v844_v16 = vsub.f32 %v836_v8, %v843_v15 }
 0x44e   :  { %845 = vst [vmem:[#allocation2] sm:$0x3] %v844_v16 }
 0x44f   :  { %1147 = shalt.err (!%p1144_p4)
}
 0x450   :  { %s1148_s16 = scalar_lea.hbm %s1525_s7, 32 }
 0x451   :  { %p1149_p5 = scmp.ne.s32.totalorder %s1525_s7, %s1148_s16  ;;  %p1152_p6 = scmp.lt.u32.totalorder %s1148_s16, %s1525_s7 }
 0x453   :  { %p1154_p7 = pnand %p1152_p6, %p1149_p5 }
 0x455   :  { %1157 = shalt.err (!%p1154_p7)
}
 0x456   :  { %855 = dma.vmem_to_hbm [thread:$0]  %s853_s6, 32, %s1525_s7, [#allocation3]  }
 0x457   :  { %1158 = dma.done.wait [#allocation3], 32  }
 0x458   :  { %1159 = vsyncadd [#allocation3], 4294967264 }
 0x459   :  { %859 = vsyncpa [#allocation3], 1 }

</bundles_post_ra>
